<compile_context>
chip_gen: v5e
topology: v5e:2x2
jax: 0.10.0
libtpu: 0.0.40
codegen_flags: <defaults>
</compile_context>

<pallas_src>
import jax
import jax.numpy as jnp
from jax import lax
from jax.experimental import pallas as pl
from jax.experimental.pallas import tpu as pltpu

KH = KW = 5
PAD = 2
EPS = 1e-5
CBLK = 128          # channels per grid step (lane-dense blocks)


def _relu_dwconv_bn_kernel(x_ref, w_ref, g_ref, b_ref, o_ref, xpad_ref):
    # x_ref   : (N, H, W, CBLK)            un-padded NHWC input block
    # w_ref   : (KH*KW, CBLK)              depthwise taps, one sublane row per tap
    # g_ref   : (1, CBLK)                  gamma
    # b_ref   : (1, CBLK)                  beta
    # o_ref   : (N, H, W, CBLK)            output block (NHWC)
    # xpad_ref: (N, H+2*PAD, W+2*PAD, CBLK) f32 VMEM scratch (fused ReLU + zero pad)
    N, H, W, CB = o_ref.shape

    # ---- fused ReLU + zero padding into VMEM scratch (no jnp.pad in wrapper) ----
    xpad_ref[...] = jnp.zeros_like(xpad_ref)
    xpad_ref[:, PAD:PAD + H, PAD:PAD + W, :] = jnp.maximum(
        x_ref[...], 0.0).astype(jnp.float32)

    # ---- depthwise 5x5 conv: 25 ref-indexed taps (VPU MACs, channels on lanes) ----
    acc = jnp.zeros((N, H, W, CB), jnp.float32)
    for kh in range(KH):
        for kw in range(KW):
            k = kh * KW + kw
            wk = w_ref[k:k + 1, :].astype(jnp.float32).reshape(1, 1, 1, CB)
            acc = acc + xpad_ref[:, kh:kh + H, kw:kw + W, :] * wk

    # ---- BatchNorm2d (training mode): per-channel batch mean / biased variance ----
    inv_n = 1.0 / (N * H * W)
    mean = jnp.sum(acc, axis=(0, 1, 2), keepdims=True) * inv_n
    centered = acc - mean
    var = jnp.sum(centered * centered, axis=(0, 1, 2), keepdims=True) * inv_n
    gamma = g_ref[...].astype(jnp.float32).reshape(1, 1, 1, CB)
    beta = b_ref[...].astype(jnp.float32).reshape(1, 1, 1, CB)
    scale = lax.rsqrt(var + EPS) * gamma
    o_ref[...] = (centered * scale + beta).astype(o_ref.dtype)


@jax.jit
def relu_dwconv_bn(x_nchw, w_oihw, gamma, beta):
    """x_nchw: (N, C, H, W); w_oihw: (C, 1, KH, KW); gamma, beta: (C,)."""
    N, C, H, W = x_nchw.shape
    Hp, Wp = H + 2 * PAD, W + 2 * PAD
    n_cblk = pl.cdiv(C, CBLK)          # 864 -> 6 full blocks + 1 partial (96)

    # Layout glue kept in the wrapper (see TODO above): NCHW -> NHWC plus a
    # one-time (C,1,KH,KW) -> (KH*KW, C) weight transpose.  No jnp.pad anymore.
    x_nhwc = jnp.transpose(x_nchw, (0, 2, 3, 1))
    w_kc = jnp.transpose(jnp.reshape(w_oihw, (C, KH * KW)), (1, 0))
    g2 = gamma.reshape(1, C)
    b2 = beta.reshape(1, C)

    out_nhwc = pl.pallas_call(
        _relu_dwconv_bn_kernel,
        out_shape=jax.ShapeDtypeStruct((N, H, W, C), x_nchw.dtype),
        grid=(n_cblk,),
        in_specs=[
            pl.BlockSpec((N, H, W, CBLK), lambda c: (0, 0, 0, c)),
            pl.BlockSpec((KH * KW, CBLK), lambda c: (0, c)),
            pl.BlockSpec((1, CBLK), lambda c: (0, c)),
            pl.BlockSpec((1, CBLK), lambda c: (0, c)),
        ],
        out_specs=pl.BlockSpec((N, H, W, CBLK), lambda c: (0, 0, 0, c)),
        # Per-step VMEM: ~25 KiB in + ~25 KiB out (double-buffered) + 62 KiB scratch
        # -> far under the scoped limit on v5e/v6e/v7x.  If N or the spatial dims
        # grow, add a grid axis over N/H (accumulating BN sums across those steps)
        # before the padded block outgrows v7x's 32 MiB scoped VMEM.
        scratch_shapes=[pltpu.VMEM((N, Hp, Wp, CBLK), jnp.float32)],
        compiler_params=pltpu.CompilerParams(
            # channel blocks are independent -> split across TensorCores on v7x
            dimension_semantics=("parallel",)),
    )(x_nhwc, w_kc, g2, b2)

    return jnp.transpose(out_nhwc, (0, 3, 1, 2))        # back to NCHW


def _reference(x, w, gamma, beta):
    """Pure-JAX reference of the module forward (training-mode BN)."""
    N, C, H, W = x.shape
    xr = jnp.maximum(x, 0.0)
    xp = jnp.pad(xr, ((0, 0), (0, 0), (PAD, PAD), (PAD, PAD)))
    y = jnp.zeros_like(x)
    for kh in range(KH):
        for kw in range(KW):
            y = y + xp[:, :, kh:kh + H, kw:kw + W] * w[:, 0, kh, kw][None, :, None, None]
    mean = jnp.mean(y, axis=(0, 2, 3), keepdims=True)
    var = jnp.mean((y - mean) ** 2, axis=(0, 2, 3), keepdims=True)
    return ((y - mean) * lax.rsqrt(var + EPS) * gamma[None, :, None, None]
            + beta[None, :, None, None])


if __name__ == "__main__":
    # Shapes consistent with the module: batch 1, 864 channels, 7x7 spatial.
    N, C, H, W = 1, 864, 7, 7

    key = jax.random.PRNGKey(0)
    kx, kw_, kg, kb = jax.random.split(key, 4)

    x = jax.random.normal(kx, (N, C, H, W), dtype=jnp.float32)
    # Conv2d(864, 864, 5x5, groups=864, bias=False) -> weight shape (864, 1, 5, 5)
    conv_w = jax.random.normal(kw_, (C, 1, KH, KW), dtype=jnp.float32) * 0.1
    # BatchNorm2d(864, affine=True) -> gamma, beta shape (864,)
    gamma = 1.0 + 0.1 * jax.random.normal(kg, (C,), dtype=jnp.float32)
    beta = 0.1 * jax.random.normal(kb, (C,), dtype=jnp.float32)

    out = relu_dwconv_bn(x, conv_w, gamma, beta)
    jax.block_until_ready(out)
    assert out.shape == (N, C, H, W)

    ref = _reference(x, conv_w, gamma, beta)
    max_err = float(jnp.max(jnp.abs(out - ref)))
    assert max_err < 2e-3, f"mismatch vs reference: max abs err = {max_err}"
    print("KERNEL_OK")
</pallas_src>

<mosaic_0001>
module attributes {stable_mosaic.version = 11 : i64} {
  func.func @_relu_dwconv_bn_kernel(%arg0: i32, %arg1: memref<1x7x7x128xf32, #tpu.memory_space<vmem>>, %arg2: memref<25x128xf32, #tpu.memory_space<vmem>>, %arg3: memref<1x128xf32, #tpu.memory_space<vmem>>, %arg4: memref<1x128xf32, #tpu.memory_space<vmem>>, %arg5: memref<1x7x7x128xf32, #tpu.memory_space<vmem>>, %arg6: memref<1x11x11x128xf32, #tpu.memory_space<vmem>>) attributes {dimension_semantics = [#tpu.dimension_semantics<parallel>], iteration_bounds = array<i64: 7>, scalar_prefetch = 0 : i64, scratch_operands = 1 : i64, tpu.core_type = #tpu.core_type<tc>, window_params = [{transform_indices = @transform_0, window_bounds = array<i64: 1, 7, 7, 128>}, {transform_indices = @transform_1, window_bounds = array<i64: 25, 128>}, {transform_indices = @transform_2, window_bounds = array<i64: 1, 128>}, {transform_indices = @transform_3, window_bounds = array<i64: 1, 128>}, {transform_indices = @transform_4, window_bounds = array<i64: 1, 7, 7, 128>}]} {
    %cst = arith.constant 0.000000e+00 : f32
    %0 = vector.broadcast %cst : f32 to vector<1x11x11x128xf32>
    %c0 = arith.constant 0 : index
    %c0_0 = arith.constant 0 : index
    %c0_1 = arith.constant 0 : index
    %c0_2 = arith.constant 0 : index
    %1 = vector.load %arg6[%c0, %c0_0, %c0_1, %c0_2] : memref<1x11x11x128xf32, #tpu.memory_space<vmem>>, vector<1x11x11x128xf32>
    tpu.vector_store %arg6[%c0, %c0_0, %c0_1, %c0_2], %0 {strides = array<i32>} : memref<1x11x11x128xf32, #tpu.memory_space<vmem>>, vector<1x11x11x128xf32>,
    %c0_3 = arith.constant 0 : index
    %c0_4 = arith.constant 0 : index
    %c0_5 = arith.constant 0 : index
    %c0_6 = arith.constant 0 : index
    %2 = vector.load %arg1[%c0_3, %c0_4, %c0_5, %c0_6] : memref<1x7x7x128xf32, #tpu.memory_space<vmem>>, vector<1x7x7x128xf32>
    %cst_7 = arith.constant 0.000000e+00 : f32
    %3 = vector.broadcast %cst_7 : f32 to vector<1x7x7x128xf32>
    %4 = arith.maximumf %2, %3 : vector<1x7x7x128xf32>
    %c0_8 = arith.constant 0 : index
    %c2 = arith.constant 2 : index
    %c2_9 = arith.constant 2 : index
    %c0_10 = arith.constant 0 : index
    %5 = vector.load %arg6[%c0_8, %c2, %c2_9, %c0_10] : memref<1x11x11x128xf32, #tpu.memory_space<vmem>>, vector<1x7x7x128xf32>
    tpu.vector_store %arg6[%c0_8, %c2, %c2_9, %c0_10], %4 {strides = array<i32>} : memref<1x11x11x128xf32, #tpu.memory_space<vmem>>, vector<1x7x7x128xf32>,
    %cst_11 = arith.constant 0.000000e+00 : f32
    %6 = vector.broadcast %cst_11 : f32 to vector<1x7x7x128xf32>
    %c0_12 = arith.constant 0 : index
    %c0_13 = arith.constant 0 : index
    %7 = vector.load %arg2[%c0_12, %c0_13] : memref<25x128xf32, #tpu.memory_space<vmem>>, vector<1x128xf32>
    %8 = vector.shape_cast %7 : vector<1x128xf32> to vector<1x1x1x128xf32>
    %c0_14 = arith.constant 0 : index
    %c0_15 = arith.constant 0 : index
    %c0_16 = arith.constant 0 : index
    %c0_17 = arith.constant 0 : index
    %9 = vector.load %arg6[%c0_14, %c0_15, %c0_16, %c0_17] : memref<1x11x11x128xf32, #tpu.memory_space<vmem>>, vector<1x7x7x128xf32>
    %10 = vector.broadcast %8 : vector<1x1x1x128xf32> to vector<1x7x7x128xf32>
    %11 = arith.mulf %9, %10 : vector<1x7x7x128xf32>
    %12 = arith.addf %6, %11 : vector<1x7x7x128xf32>
    %c1 = arith.constant 1 : index
    %c0_18 = arith.constant 0 : index
    %13 = vector.load %arg2[%c1, %c0_18] : memref<25x128xf32, #tpu.memory_space<vmem>>, vector<1x128xf32>
    %14 = vector.shape_cast %13 : vector<1x128xf32> to vector<1x1x1x128xf32>
    %c0_19 = arith.constant 0 : index
    %c0_20 = arith.constant 0 : index
    %c1_21 = arith.constant 1 : index
    %c0_22 = arith.constant 0 : index
    %15 = vector.load %arg6[%c0_19, %c0_20, %c1_21, %c0_22] : memref<1x11x11x128xf32, #tpu.memory_space<vmem>>, vector<1x7x7x128xf32>
    %16 = vector.broadcast %14 : vector<1x1x1x128xf32> to vector<1x7x7x128xf32>
    %17 = arith.mulf %15, %16 : vector<1x7x7x128xf32>
    %18 = arith.addf %12, %17 : vector<1x7x7x128xf32>
    %c2_23 = arith.constant 2 : index
    %c0_24 = arith.constant 0 : index
    %19 = vector.load %arg2[%c2_23, %c0_24] : memref<25x128xf32, #tpu.memory_space<vmem>>, vector<1x128xf32>
    %20 = vector.shape_cast %19 : vector<1x128xf32> to vector<1x1x1x128xf32>
    %c0_25 = arith.constant 0 : index
    %c0_26 = arith.constant 0 : index
    %c2_27 = arith.constant 2 : index
    %c0_28 = arith.constant 0 : index
    %21 = vector.load %arg6[%c0_25, %c0_26, %c2_27, %c0_28] : memref<1x11x11x128xf32, #tpu.memory_space<vmem>>, vector<1x7x7x128xf32>
    %22 = vector.broadcast %20 : vector<1x1x1x128xf32> to vector<1x7x7x128xf32>
    %23 = arith.mulf %21, %22 : vector<1x7x7x128xf32>
    %24 = arith.addf %18, %23 : vector<1x7x7x128xf32>
    %c3 = arith.constant 3 : index
    %c0_29 = arith.constant 0 : index
    %25 = vector.load %arg2[%c3, %c0_29] : memref<25x128xf32, #tpu.memory_space<vmem>>, vector<1x128xf32>
    %26 = vector.shape_cast %25 : vector<1x128xf32> to vector<1x1x1x128xf32>
    %c0_30 = arith.constant 0 : index
    %c0_31 = arith.constant 0 : index
    %c3_32 = arith.constant 3 : index
    %c0_33 = arith.constant 0 : index
    %27 = vector.load %arg6[%c0_30, %c0_31, %c3_32, %c0_33] : memref<1x11x11x128xf32, #tpu.memory_space<vmem>>, vector<1x7x7x128xf32>
    %28 = vector.broadcast %26 : vector<1x1x1x128xf32> to vector<1x7x7x128xf32>
    %29 = arith.mulf %27, %28 : vector<1x7x7x128xf32>
    %30 = arith.addf %24, %29 : vector<1x7x7x128xf32>
    %c4 = arith.constant 4 : index
    %c0_34 = arith.constant 0 : index
    %31 = vector.load %arg2[%c4, %c0_34] : memref<25x128xf32, #tpu.memory_space<vmem>>, vector<1x128xf32>
    %32 = vector.shape_cast %31 : vector<1x128xf32> to vector<1x1x1x128xf32>
    %c0_35 = arith.constant 0 : index
    %c0_36 = arith.constant 0 : index
    %c4_37 = arith.constant 4 : index
    %c0_38 = arith.constant 0 : index
    %33 = vector.load %arg6[%c0_35, %c0_36, %c4_37, %c0_38] : memref<1x11x11x128xf32, #tpu.memory_space<vmem>>, vector<1x7x7x128xf32>
    %34 = vector.broadcast %32 : vector<1x1x1x128xf32> to vector<1x7x7x128xf32>
    %35 = arith.mulf %33, %34 : vector<1x7x7x128xf32>
    %36 = arith.addf %30, %35 : vector<1x7x7x128xf32>
    %c5 = arith.constant 5 : index
    %c0_39 = arith.constant 0 : index
    %37 = vector.load %arg2[%c5, %c0_39] : memref<25x128xf32, #tpu.memory_space<vmem>>, vector<1x128xf32>
    %38 = vector.shape_cast %37 : vector<1x128xf32> to vector<1x1x1x128xf32>
    %c0_40 = arith.constant 0 : index
    %c1_41 = arith.constant 1 : index
    %c0_42 = arith.constant 0 : index
    %c0_43 = arith.constant 0 : index
    %39 = vector.load %arg6[%c0_40, %c1_41, %c0_42, %c0_43] : memref<1x11x11x128xf32, #tpu.memory_space<vmem>>, vector<1x7x7x128xf32>
    %40 = vector.broadcast %38 : vector<1x1x1x128xf32> to vector<1x7x7x128xf32>
    %41 = arith.mulf %39, %40 : vector<1x7x7x128xf32>
    %42 = arith.addf %36, %41 : vector<1x7x7x128xf32>
    %c6 = arith.constant 6 : index
    %c0_44 = arith.constant 0 : index
    %43 = vector.load %arg2[%c6, %c0_44] : memref<25x128xf32, #tpu.memory_space<vmem>>, vector<1x128xf32>
    %44 = vector.shape_cast %43 : vector<1x128xf32> to vector<1x1x1x128xf32>
    %c0_45 = arith.constant 0 : index
    %c1_46 = arith.constant 1 : index
    %c1_47 = arith.constant 1 : index
    %c0_48 = arith.constant 0 : index
    %45 = vector.load %arg6[%c0_45, %c1_46, %c1_47, %c0_48] : memref<1x11x11x128xf32, #tpu.memory_space<vmem>>, vector<1x7x7x128xf32>
    %46 = vector.broadcast %44 : vector<1x1x1x128xf32> to vector<1x7x7x128xf32>
    %47 = arith.mulf %45, %46 : vector<1x7x7x128xf32>
    %48 = arith.addf %42, %47 : vector<1x7x7x128xf32>
    %c7 = arith.constant 7 : index
    %c0_49 = arith.constant 0 : index
    %49 = vector.load %arg2[%c7, %c0_49] : memref<25x128xf32, #tpu.memory_space<vmem>>, vector<1x128xf32>
    %50 = vector.shape_cast %49 : vector<1x128xf32> to vector<1x1x1x128xf32>
    %c0_50 = arith.constant 0 : index
    %c1_51 = arith.constant 1 : index
    %c2_52 = arith.constant 2 : index
    %c0_53 = arith.constant 0 : index
    %51 = vector.load %arg6[%c0_50, %c1_51, %c2_52, %c0_53] : memref<1x11x11x128xf32, #tpu.memory_space<vmem>>, vector<1x7x7x128xf32>
    %52 = vector.broadcast %50 : vector<1x1x1x128xf32> to vector<1x7x7x128xf32>
    %53 = arith.mulf %51, %52 : vector<1x7x7x128xf32>
    %54 = arith.addf %48, %53 : vector<1x7x7x128xf32>
    %c8 = arith.constant 8 : index
    %c0_54 = arith.constant 0 : index
    %55 = vector.load %arg2[%c8, %c0_54] : memref<25x128xf32, #tpu.memory_space<vmem>>, vector<1x128xf32>
    %56 = vector.shape_cast %55 : vector<1x128xf32> to vector<1x1x1x128xf32>
    %c0_55 = arith.constant 0 : index
    %c1_56 = arith.constant 1 : index
    %c3_57 = arith.constant 3 : index
    %c0_58 = arith.constant 0 : index
    %57 = vector.load %arg6[%c0_55, %c1_56, %c3_57, %c0_58] : memref<1x11x11x128xf32, #tpu.memory_space<vmem>>, vector<1x7x7x128xf32>
    %58 = vector.broadcast %56 : vector<1x1x1x128xf32> to vector<1x7x7x128xf32>
    %59 = arith.mulf %57, %58 : vector<1x7x7x128xf32>
    %60 = arith.addf %54, %59 : vector<1x7x7x128xf32>
    %c9 = arith.constant 9 : index
    %c0_59 = arith.constant 0 : index
    %61 = vector.load %arg2[%c9, %c0_59] : memref<25x128xf32, #tpu.memory_space<vmem>>, vector<1x128xf32>
    %62 = vector.shape_cast %61 : vector<1x128xf32> to vector<1x1x1x128xf32>
    %c0_60 = arith.constant 0 : index
    %c1_61 = arith.constant 1 : index
    %c4_62 = arith.constant 4 : index
    %c0_63 = arith.constant 0 : index
    %63 = vector.load %arg6[%c0_60, %c1_61, %c4_62, %c0_63] : memref<1x11x11x128xf32, #tpu.memory_space<vmem>>, vector<1x7x7x128xf32>
    %64 = vector.broadcast %62 : vector<1x1x1x128xf32> to vector<1x7x7x128xf32>
    %65 = arith.mulf %63, %64 : vector<1x7x7x128xf32>
    %66 = arith.addf %60, %65 : vector<1x7x7x128xf32>
    %c10 = arith.constant 10 : index
    %c0_64 = arith.constant 0 : index
    %67 = vector.load %arg2[%c10, %c0_64] : memref<25x128xf32, #tpu.memory_space<vmem>>, vector<1x128xf32>
    %68 = vector.shape_cast %67 : vector<1x128xf32> to vector<1x1x1x128xf32>
    %c0_65 = arith.constant 0 : index
    %c2_66 = arith.constant 2 : index
    %c0_67 = arith.constant 0 : index
    %c0_68 = arith.constant 0 : index
    %69 = vector.load %arg6[%c0_65, %c2_66, %c0_67, %c0_68] : memref<1x11x11x128xf32, #tpu.memory_space<vmem>>, vector<1x7x7x128xf32>
    %70 = vector.broadcast %68 : vector<1x1x1x128xf32> to vector<1x7x7x128xf32>
    %71 = arith.mulf %69, %70 : vector<1x7x7x128xf32>
    %72 = arith.addf %66, %71 : vector<1x7x7x128xf32>
    %c11 = arith.constant 11 : index
    %c0_69 = arith.constant 0 : index
    %73 = vector.load %arg2[%c11, %c0_69] : memref<25x128xf32, #tpu.memory_space<vmem>>, vector<1x128xf32>
    %74 = vector.shape_cast %73 : vector<1x128xf32> to vector<1x1x1x128xf32>
    %c0_70 = arith.constant 0 : index
    %c2_71 = arith.constant 2 : index
    %c1_72 = arith.constant 1 : index
    %c0_73 = arith.constant 0 : index
    %75 = vector.load %arg6[%c0_70, %c2_71, %c1_72, %c0_73] : memref<1x11x11x128xf32, #tpu.memory_space<vmem>>, vector<1x7x7x128xf32>
    %76 = vector.broadcast %74 : vector<1x1x1x128xf32> to vector<1x7x7x128xf32>
    %77 = arith.mulf %75, %76 : vector<1x7x7x128xf32>
    %78 = arith.addf %72, %77 : vector<1x7x7x128xf32>
    %c12 = arith.constant 12 : index
    %c0_74 = arith.constant 0 : index
    %79 = vector.load %arg2[%c12, %c0_74] : memref<25x128xf32, #tpu.memory_space<vmem>>, vector<1x128xf32>
    %80 = vector.shape_cast %79 : vector<1x128xf32> to vector<1x1x1x128xf32>
    %c0_75 = arith.constant 0 : index
    %c2_76 = arith.constant 2 : index
    %c2_77 = arith.constant 2 : index
    %c0_78 = arith.constant 0 : index
    %81 = vector.load %arg6[%c0_75, %c2_76, %c2_77, %c0_78] : memref<1x11x11x128xf32, #tpu.memory_space<vmem>>, vector<1x7x7x128xf32>
    %82 = vector.broadcast %80 : vector<1x1x1x128xf32> to vector<1x7x7x128xf32>
    %83 = arith.mulf %81, %82 : vector<1x7x7x128xf32>
    %84 = arith.addf %78, %83 : vector<1x7x7x128xf32>
    %c13 = arith.constant 13 : index
    %c0_79 = arith.constant 0 : index
    %85 = vector.load %arg2[%c13, %c0_79] : memref<25x128xf32, #tpu.memory_space<vmem>>, vector<1x128xf32>
    %86 = vector.shape_cast %85 : vector<1x128xf32> to vector<1x1x1x128xf32>
    %c0_80 = arith.constant 0 : index
    %c2_81 = arith.constant 2 : index
    %c3_82 = arith.constant 3 : index
    %c0_83 = arith.constant 0 : index
    %87 = vector.load %arg6[%c0_80, %c2_81, %c3_82, %c0_83] : memref<1x11x11x128xf32, #tpu.memory_space<vmem>>, vector<1x7x7x128xf32>
    %88 = vector.broadcast %86 : vector<1x1x1x128xf32> to vector<1x7x7x128xf32>
    %89 = arith.mulf %87, %88 : vector<1x7x7x128xf32>
    %90 = arith.addf %84, %89 : vector<1x7x7x128xf32>
    %c14 = arith.constant 14 : index
    %c0_84 = arith.constant 0 : index
    %91 = vector.load %arg2[%c14, %c0_84] : memref<25x128xf32, #tpu.memory_space<vmem>>, vector<1x128xf32>
    %92 = vector.shape_cast %91 : vector<1x128xf32> to vector<1x1x1x128xf32>
    %c0_85 = arith.constant 0 : index
    %c2_86 = arith.constant 2 : index
    %c4_87 = arith.constant 4 : index
    %c0_88 = arith.constant 0 : index
    %93 = vector.load %arg6[%c0_85, %c2_86, %c4_87, %c0_88] : memref<1x11x11x128xf32, #tpu.memory_space<vmem>>, vector<1x7x7x128xf32>
    %94 = vector.broadcast %92 : vector<1x1x1x128xf32> to vector<1x7x7x128xf32>
    %95 = arith.mulf %93, %94 : vector<1x7x7x128xf32>
    %96 = arith.addf %90, %95 : vector<1x7x7x128xf32>
    %c15 = arith.constant 15 : index
    %c0_89 = arith.constant 0 : index
    %97 = vector.load %arg2[%c15, %c0_89] : memref<25x128xf32, #tpu.memory_space<vmem>>, vector<1x128xf32>
    %98 = vector.shape_cast %97 : vector<1x128xf32> to vector<1x1x1x128xf32>
    %c0_90 = arith.constant 0 : index
    %c3_91 = arith.constant 3 : index
    %c0_92 = arith.constant 0 : index
    %c0_93 = arith.constant 0 : index
    %99 = vector.load %arg6[%c0_90, %c3_91, %c0_92, %c0_93] : memref<1x11x11x128xf32, #tpu.memory_space<vmem>>, vector<1x7x7x128xf32>
    %100 = vector.broadcast %98 : vector<1x1x1x128xf32> to vector<1x7x7x128xf32>
    %101 = arith.mulf %99, %100 : vector<1x7x7x128xf32>
    %102 = arith.addf %96, %101 : vector<1x7x7x128xf32>
    %c16 = arith.constant 16 : index
    %c0_94 = arith.constant 0 : index
    %103 = vector.load %arg2[%c16, %c0_94] : memref<25x128xf32, #tpu.memory_space<vmem>>, vector<1x128xf32>
    %104 = vector.shape_cast %103 : vector<1x128xf32> to vector<1x1x1x128xf32>
    %c0_95 = arith.constant 0 : index
    %c3_96 = arith.constant 3 : index
    %c1_97 = arith.constant 1 : index
    %c0_98 = arith.constant 0 : index
    %105 = vector.load %arg6[%c0_95, %c3_96, %c1_97, %c0_98] : memref<1x11x11x128xf32, #tpu.memory_space<vmem>>, vector<1x7x7x128xf32>
    %106 = vector.broadcast %104 : vector<1x1x1x128xf32> to vector<1x7x7x128xf32>
    %107 = arith.mulf %105, %106 : vector<1x7x7x128xf32>
    %108 = arith.addf %102, %107 : vector<1x7x7x128xf32>
    %c17 = arith.constant 17 : index
    %c0_99 = arith.constant 0 : index
    %109 = vector.load %arg2[%c17, %c0_99] : memref<25x128xf32, #tpu.memory_space<vmem>>, vector<1x128xf32>
    %110 = vector.shape_cast %109 : vector<1x128xf32> to vector<1x1x1x128xf32>
    %c0_100 = arith.constant 0 : index
    %c3_101 = arith.constant 3 : index
    %c2_102 = arith.constant 2 : index
    %c0_103 = arith.constant 0 : index
    %111 = vector.load %arg6[%c0_100, %c3_101, %c2_102, %c0_103] : memref<1x11x11x128xf32, #tpu.memory_space<vmem>>, vector<1x7x7x128xf32>
    %112 = vector.broadcast %110 : vector<1x1x1x128xf32> to vector<1x7x7x128xf32>
    %113 = arith.mulf %111, %112 : vector<1x7x7x128xf32>
    %114 = arith.addf %108, %113 : vector<1x7x7x128xf32>
    %c18 = arith.constant 18 : index
    %c0_104 = arith.constant 0 : index
    %115 = vector.load %arg2[%c18, %c0_104] : memref<25x128xf32, #tpu.memory_space<vmem>>, vector<1x128xf32>
    %116 = vector.shape_cast %115 : vector<1x128xf32> to vector<1x1x1x128xf32>
    %c0_105 = arith.constant 0 : index
    %c3_106 = arith.constant 3 : index
    %c3_107 = arith.constant 3 : index
    %c0_108 = arith.constant 0 : index
    %117 = vector.load %arg6[%c0_105, %c3_106, %c3_107, %c0_108] : memref<1x11x11x128xf32, #tpu.memory_space<vmem>>, vector<1x7x7x128xf32>
    %118 = vector.broadcast %116 : vector<1x1x1x128xf32> to vector<1x7x7x128xf32>
    %119 = arith.mulf %117, %118 : vector<1x7x7x128xf32>
    %120 = arith.addf %114, %119 : vector<1x7x7x128xf32>
    %c19 = arith.constant 19 : index
    %c0_109 = arith.constant 0 : index
    %121 = vector.load %arg2[%c19, %c0_109] : memref<25x128xf32, #tpu.memory_space<vmem>>, vector<1x128xf32>
    %122 = vector.shape_cast %121 : vector<1x128xf32> to vector<1x1x1x128xf32>
    %c0_110 = arith.constant 0 : index
    %c3_111 = arith.constant 3 : index
    %c4_112 = arith.constant 4 : index
    %c0_113 = arith.constant 0 : index
    %123 = vector.load %arg6[%c0_110, %c3_111, %c4_112, %c0_113] : memref<1x11x11x128xf32, #tpu.memory_space<vmem>>, vector<1x7x7x128xf32>
    %124 = vector.broadcast %122 : vector<1x1x1x128xf32> to vector<1x7x7x128xf32>
    %125 = arith.mulf %123, %124 : vector<1x7x7x128xf32>
    %126 = arith.addf %120, %125 : vector<1x7x7x128xf32>
    %c20 = arith.constant 20 : index
    %c0_114 = arith.constant 0 : index
    %127 = vector.load %arg2[%c20, %c0_114] : memref<25x128xf32, #tpu.memory_space<vmem>>, vector<1x128xf32>
    %128 = vector.shape_cast %127 : vector<1x128xf32> to vector<1x1x1x128xf32>
    %c0_115 = arith.constant 0 : index
    %c4_116 = arith.constant 4 : index
    %c0_117 = arith.constant 0 : index
    %c0_118 = arith.constant 0 : index
    %129 = vector.load %arg6[%c0_115, %c4_116, %c0_117, %c0_118] : memref<1x11x11x128xf32, #tpu.memory_space<vmem>>, vector<1x7x7x128xf32>
    %130 = vector.broadcast %128 : vector<1x1x1x128xf32> to vector<1x7x7x128xf32>
    %131 = arith.mulf %129, %130 : vector<1x7x7x128xf32>
    %132 = arith.addf %126, %131 : vector<1x7x7x128xf32>
    %c21 = arith.constant 21 : index
    %c0_119 = arith.constant 0 : index
    %133 = vector.load %arg2[%c21, %c0_119] : memref<25x128xf32, #tpu.memory_space<vmem>>, vector<1x128xf32>
    %134 = vector.shape_cast %133 : vector<1x128xf32> to vector<1x1x1x128xf32>
    %c0_120 = arith.constant 0 : index
    %c4_121 = arith.constant 4 : index
    %c1_122 = arith.constant 1 : index
    %c0_123 = arith.constant 0 : index
    %135 = vector.load %arg6[%c0_120, %c4_121, %c1_122, %c0_123] : memref<1x11x11x128xf32, #tpu.memory_space<vmem>>, vector<1x7x7x128xf32>
    %136 = vector.broadcast %134 : vector<1x1x1x128xf32> to vector<1x7x7x128xf32>
    %137 = arith.mulf %135, %136 : vector<1x7x7x128xf32>
    %138 = arith.addf %132, %137 : vector<1x7x7x128xf32>
    %c22 = arith.constant 22 : index
    %c0_124 = arith.constant 0 : index
    %139 = vector.load %arg2[%c22, %c0_124] : memref<25x128xf32, #tpu.memory_space<vmem>>, vector<1x128xf32>
    %140 = vector.shape_cast %139 : vector<1x128xf32> to vector<1x1x1x128xf32>
    %c0_125 = arith.constant 0 : index
    %c4_126 = arith.constant 4 : index
    %c2_127 = arith.constant 2 : index
    %c0_128 = arith.constant 0 : index
    %141 = vector.load %arg6[%c0_125, %c4_126, %c2_127, %c0_128] : memref<1x11x11x128xf32, #tpu.memory_space<vmem>>, vector<1x7x7x128xf32>
    %142 = vector.broadcast %140 : vector<1x1x1x128xf32> to vector<1x7x7x128xf32>
    %143 = arith.mulf %141, %142 : vector<1x7x7x128xf32>
    %144 = arith.addf %138, %143 : vector<1x7x7x128xf32>
    %c23 = arith.constant 23 : index
    %c0_129 = arith.constant 0 : index
    %145 = vector.load %arg2[%c23, %c0_129] : memref<25x128xf32, #tpu.memory_space<vmem>>, vector<1x128xf32>
    %146 = vector.shape_cast %145 : vector<1x128xf32> to vector<1x1x1x128xf32>
    %c0_130 = arith.constant 0 : index
    %c4_131 = arith.constant 4 : index
    %c3_132 = arith.constant 3 : index
    %c0_133 = arith.constant 0 : index
    %147 = vector.load %arg6[%c0_130, %c4_131, %c3_132, %c0_133] : memref<1x11x11x128xf32, #tpu.memory_space<vmem>>, vector<1x7x7x128xf32>
    %148 = vector.broadcast %146 : vector<1x1x1x128xf32> to vector<1x7x7x128xf32>
    %149 = arith.mulf %147, %148 : vector<1x7x7x128xf32>
    %150 = arith.addf %144, %149 : vector<1x7x7x128xf32>
    %c24 = arith.constant 24 : index
    %c0_134 = arith.constant 0 : index
    %151 = vector.load %arg2[%c24, %c0_134] : memref<25x128xf32, #tpu.memory_space<vmem>>, vector<1x128xf32>
    %152 = vector.shape_cast %151 : vector<1x128xf32> to vector<1x1x1x128xf32>
    %c0_135 = arith.constant 0 : index
    %c4_136 = arith.constant 4 : index
    %c4_137 = arith.constant 4 : index
    %c0_138 = arith.constant 0 : index
    %153 = vector.load %arg6[%c0_135, %c4_136, %c4_137, %c0_138] : memref<1x11x11x128xf32, #tpu.memory_space<vmem>>, vector<1x7x7x128xf32>
    %154 = vector.broadcast %152 : vector<1x1x1x128xf32> to vector<1x7x7x128xf32>
    %155 = arith.mulf %153, %154 : vector<1x7x7x128xf32>
    %156 = arith.addf %150, %155 : vector<1x7x7x128xf32>
    %cst_139 = arith.constant dense<0.000000e+00> : vector<128xf32>
    %157 = vector.multi_reduction <add>, %156, %cst_139 [0, 1, 2] : vector<1x7x7x128xf32> to vector<128xf32>
    %158 = vector.shape_cast %157 : vector<128xf32> to vector<1x1x1x128xf32>
    %cst_140 = arith.constant 0.0204081628 : f32
    %159 = vector.broadcast %cst_140 : f32 to vector<1x1x1x128xf32>
    %160 = arith.mulf %158, %159 : vector<1x1x1x128xf32>
    %161 = vector.broadcast %160 : vector<1x1x1x128xf32> to vector<1x7x7x128xf32>
    %162 = arith.subf %156, %161 : vector<1x7x7x128xf32>
    %163 = arith.mulf %162, %162 : vector<1x7x7x128xf32>
    %cst_141 = arith.constant dense<0.000000e+00> : vector<128xf32>
    %164 = vector.multi_reduction <add>, %163, %cst_141 [0, 1, 2] : vector<1x7x7x128xf32> to vector<128xf32>
    %165 = vector.shape_cast %164 : vector<128xf32> to vector<1x1x1x128xf32>
    %cst_142 = arith.constant 0.0204081628 : f32
    %166 = vector.broadcast %cst_142 : f32 to vector<1x1x1x128xf32>
    %167 = arith.mulf %165, %166 : vector<1x1x1x128xf32>
    %c0_143 = arith.constant 0 : index
    %c0_144 = arith.constant 0 : index
    %168 = vector.load %arg3[%c0_143, %c0_144] : memref<1x128xf32, #tpu.memory_space<vmem>>, vector<1x128xf32>
    %169 = vector.shape_cast %168 : vector<1x128xf32> to vector<1x1x1x128xf32>
    %c0_145 = arith.constant 0 : index
    %c0_146 = arith.constant 0 : index
    %170 = vector.load %arg4[%c0_145, %c0_146] : memref<1x128xf32, #tpu.memory_space<vmem>>, vector<1x128xf32>
    %171 = vector.shape_cast %170 : vector<1x128xf32> to vector<1x1x1x128xf32>
    %cst_147 = arith.constant 9.99999974E-6 : f32
    %172 = vector.broadcast %cst_147 : f32 to vector<1x1x1x128xf32>
    %173 = arith.addf %167, %172 : vector<1x1x1x128xf32>
    %174 = math.rsqrt %173 : vector<1x1x1x128xf32>
    %175 = arith.mulf %174, %169 : vector<1x1x1x128xf32>
    %176 = vector.broadcast %175 : vector<1x1x1x128xf32> to vector<1x7x7x128xf32>
    %177 = arith.mulf %162, %176 : vector<1x7x7x128xf32>
    %178 = vector.broadcast %171 : vector<1x1x1x128xf32> to vector<1x7x7x128xf32>
    %179 = arith.addf %177, %178 : vector<1x7x7x128xf32>
    %c0_148 = arith.constant 0 : index
    %c0_149 = arith.constant 0 : index
    %c0_150 = arith.constant 0 : index
    %c0_151 = arith.constant 0 : index
    %180 = vector.load %arg5[%c0_148, %c0_149, %c0_150, %c0_151] : memref<1x7x7x128xf32, #tpu.memory_space<vmem>>, vector<1x7x7x128xf32>
    tpu.vector_store %arg5[%c0_148, %c0_149, %c0_150, %c0_151], %179 {strides = array<i32>} : memref<1x7x7x128xf32, #tpu.memory_space<vmem>>, vector<1x7x7x128xf32>,
    return
  }
  func.func @transform_0(%arg0: i32) -> (i32, i32, i32, i32) {
    %c0_i32 = arith.constant 0 : i32
    %c0_i32_0 = arith.constant 0 : i32
    %c0_i32_1 = arith.constant 0 : i32
    %c0_i32_2 = arith.constant 0 : i32
    return %c0_i32, %c0_i32_0, %c0_i32_1, %arg0 : i32, i32, i32, i32
  }
  func.func @transform_1(%arg0: i32) -> (i32, i32) {
    %c0_i32 = arith.constant 0 : i32
    %c0_i32_0 = arith.constant 0 : i32
    return %c0_i32, %arg0 : i32, i32
  }
  func.func @transform_2(%arg0: i32) -> (i32, i32) {
    %c0_i32 = arith.constant 0 : i32
    %c0_i32_0 = arith.constant 0 : i32
    return %c0_i32, %arg0 : i32, i32
  }
  func.func @transform_3(%arg0: i32) -> (i32, i32) {
    %c0_i32 = arith.constant 0 : i32
    %c0_i32_0 = arith.constant 0 : i32
    return %c0_i32, %arg0 : i32, i32
  }
  func.func @transform_4(%arg0: i32) -> (i32, i32, i32, i32) {
    %c0_i32 = arith.constant 0 : i32
    %c0_i32_0 = arith.constant 0 : i32
    %c0_i32_1 = arith.constant 0 : i32
    %c0_i32_2 = arith.constant 0 : i32
    return %c0_i32, %c0_i32_0, %c0_i32_1, %arg0 : i32, i32, i32, i32
  }
}

</mosaic_0001>

<bundles_post_ra>
// kernel: relu_dwconv_bn.1
= control target key start
LH: loop header
LB: loop body
LE: loop exit
PB: predicated region body
PF: predicated region fallthrough
CT: control target
= control target key end

     0   :  { %s1337_s15 = smov 0   ;;  %s1339_s16 = smov 0   ;;  %s1764_s0 = inlined_call_operand.vmem [shape: f32[1,7,7,864], index: 0, kind: input, shape index: {}]   ;;  %s1765_s1 = inlined_call_operand.vmem [shape: f32[25,864], index: 1, kind: input, shape index: {}]   ;;  %s1766_s2 = inlined_call_operand.vmem [shape: f32[1,864], index: 2, kind: input, shape index: {}]   ;;  %s1767_s3 = inlined_call_operand.vmem [shape: f32[1,864], index: 3, kind: input, shape index: {}]   ;;  %s1768_s4 = inlined_call_operand.vmem [shape: f32[1,7,7,864], index: 4, kind: output, shape index: {}]  }
   0x1   :  { %s1341_s17 = smov 0  }
   0x2 LB: > { %s1353_s18 = sadd.s32 4294967295, %s1309_s17   ;;  %s1356_s19 = sadd.s32 1, %s1309_s17   ;;  %s1309_s17 = sphi %s1341_s17, %s1794_s17   ;;  %s1305_s16 = sphi %s1339_s16, %s1793_s16   ;;  %s1301_s15 = sphi %s1337_s15, %s1792_s15  }
   0x3   : > { %s18_s20 = ssub.s32 %s1309_s17, %s1356_s19  ;;  %s21_s21 = sadd.s32 1, %s1305_s16 }
   0x4   : > { %p19_p0 = scmp.eq.s32.totalorder %s18_s20, 0  ;;  %p28_p1 = scmp.ne.s32.totalorder %s1305_s16, %s1301_s15 }
   0x5   : > { %p29_p2 = scmp.eq.s32.totalorder %s1309_s17, 0  ;;  %p136_p3 = scmp.eq.s32.totalorder %s1353_s18, 6 }
   0x6   : > { %s1366_s22 = scalar_select %p19_p0, %s1305_s16, %s21_s21  }
   0x7   : > { %p1368_p4 = por %p29_p2, %p28_p1  ;;  %p1372_p5 = por %p136_p3, %p28_p1 }
   0x8   : > { %p1223_p6 = scmp.ge.s32.totalorder %s1309_s17, 7 }
   0xa   : > { %158 = sbr.rel (%p1223_p6) target bundleno = 34 (0x22), region = 16 }
   0xf   : > { %161 = sbr.rel (!%p1368_p4) target bundleno = 26 (0x1a), region = 20  ;;  %s163_s25 = sand.u32 (%p1368_p4), 1, %s1305_s16  }
  0x10   : > { %s1224_s26 = sshll.u32 (%p1368_p4), %s1309_s17, 3  ;;  %s1232_s27 = smul.u32 (%p1368_p4), 56, %s163_s25 }
  0x11   : > { %s167_s30 = scalar_lea.vmem (%p1368_p4), %s1764_s0, %s1224_s26 }
  0x12   : > { %v208_v0 = vld [vmem:[%s167_s30] sm:$0xff] (%p1368_p4)  ;;  %v210_v1 = vld [vmem:[%s167_s30 + $0x38] sm:$0xff] (%p1368_p4)  ;;  %v212_v2 = vld [vmem:[%s167_s30 + $0x70] sm:$0xff] (%p1368_p4)  ;;  %s165_s5 = scalar_lea.vmem (%p1368_p4), [#allocation3], %s1232_s27 }
  0x13   : > { %209 = vst [vmem:[%s165_s5] sm:$0xff] (%p1368_p4), %v208_v0  ;;  %v214_v3 = vld [vmem:[%s167_s30 + $0xa8] sm:$0xff] (%p1368_p4)  ;;  %v216_v4 = vld [vmem:[%s167_s30 + $0xe0] sm:$0xff] (%p1368_p4)  ;;  %v218_v5 = vld [vmem:[%s167_s30 + $0x118] sm:$0xff] (%p1368_p4) }
  0x14   : > { %211 = vst [vmem:[%s165_s5 + $0x8] sm:$0xff] %v210_v1  ;;  %v220_v6 = vld [vmem:[%s167_s30 + $0x150] sm:$0xff] }
  0x15   : > { %213 = vst [vmem:[%s165_s5 + $0x10] sm:$0xff] %v212_v2 }
  0x16   : > { %215 = vst [vmem:[%s165_s5 + $0x18] sm:$0xff] %v214_v3 }
  0x17   : > { %217 = vst [vmem:[%s165_s5 + $0x20] sm:$0xff] %v216_v4 }
  0x18   : > { %219 = vst [vmem:[%s165_s5 + $0x28] sm:$0xff] %v218_v5 }
  0x19   : > { %221 = vst [vmem:[%s165_s5 + $0x30] sm:$0xff] %v220_v6 }
  0x1a PF: > { %227 = sbr.rel (!%p1368_p4) target bundleno = 34 (0x22), region = 58  ;;  %s229_s6 = sand.u32 (%p1368_p4), 1, %s1305_s16  }
  0x1b   : > { %s1226_s7 = sshll.u32 (%p1368_p4), %s1309_s17, 3  ;;  %s1225_s8 = sshll.u32 (%p1368_p4), %s229_s6, 5 }
  0x1c   : > { %s233_s11 = scalar_lea.vmem (%p1368_p4), %s1765_s1, %s1226_s7  ;;  %s231_s12 = scalar_lea.vmem (%p1368_p4), [#allocation4], %s1225_s8 }
  0x1d   : > { %v268_v7 = vld [vmem:[%s233_s11] sm:$0xff] (%p1368_p4)  ;;  %v270_v8 = vld [vmem:[%s233_s11 + $0x38] sm:$0xff] (%p1368_p4)  ;;  %v272_v9 = vld [vmem:[%s233_s11 + $0x70] sm:$0xff] (%p1368_p4) }
  0x1e   : > { %269 = vst [vmem:[%s231_s12] sm:$0xff] (%p1368_p4), %v268_v7  ;;  %v274_v10 = vld [vmem:[%s233_s11 + $0xa8] sm:$0xff] (%p1368_p4) }
  0x1f   : > { %271 = vst [vmem:[%s231_s12 + $0x8] sm:$0xff] %v270_v8 }
  0x20   : > { %273 = vst [vmem:[%s231_s12 + $0x10] sm:$0xff] %v272_v9 }
  0x21   : > { %275 = vst [vmem:[%s231_s12 + $0x18] sm:$0xff] %v274_v10 }
  0x22 PF: > { %p1227_p7 = scmp.ge.s32.totalorder %s1309_s17, 1  ;;  %p292_p8 = scmp.lt.s32.totalorder %s1309_s17, 8 }
  0x24   : > { %p293_p9 = pnand %p1227_p7, %p292_p8 }
  0x26   : > { %296 = sbr.rel (%p293_p9) target bundleno = 270 (0x10e), region = 104 }
  0x2b   : > { %s299_s13 = sand.u32 1, %s1301_s15   ;;  %v1311_v11 = vmov 0.0   ;;  %p340_p10 = scmp.lt.s32.totalorder %s1353_s18, 6  ;;  %vm968_vm0 = vcmask 1046528  }
  0x2c   : > { %346 = vst [vmem:[#allocation2] sm:$0xff] %v1311_v11  ;;  %s1228_s14 = sshll.u32 %s299_s13, 5  ;;  %s1396_s21 = smul.u32 56, %s299_s13 }
  0x2d   : > { %347 = vst [vmem:[#allocation2 + $0x8] sm:$0x7] %v1311_v11  ;;  %s1394_s20 = scalar_lea.vmem [#allocation4], %s1228_s14  ;;  %s1229_s7 = sshll.u32 (%p1372_p5), %s1353_s18, 3 }
  0x2e   : > { %348 = vst [vmem:[#allocation2 + $0x10] sm:$0xff] %v1311_v11  ;;  %s1399_s15 = scalar_lea.vmem [#allocation3], %s1396_s21  ;;  %v1404_v16 = vld [vmem:[%s1394_s20] ss:$0 sm:$0xff]  ;;  %v1407_v17 = vld [vmem:[%s1394_s20 + $0x1] ss:$0 sm:$0xff]  ;;  %s1070_s10 = scalar_lea.vmem (%p1372_p5), %s1768_s4, %s1229_s7 }
  0x2f   : > { %349 = vst [vmem:[#allocation2 + $0x18] sm:$0x7] %v1311_v11  ;;  %v368_v12 = vld [vmem:[%s1399_s15] sm:$0x7f]  ;;  %v369_v14 = vld [vmem:[%s1399_s15 + $0x8] sm:$0x7f] }
  0x30   : > { %350 = vst [vmem:[#allocation2 + $0x20] sm:$0xff] %v1311_v11  ;;  %v375_v13 = vmax.f32 %v368_v12, 0.0  ;;  %v376_v15 = vmax.f32 %v369_v14, 0.0  ;;  %v1412_v23 = vld [vmem:[%s1394_s20 + $0x2] ss:$0 sm:$0xff]  ;;  %s1661_s17 = scalar_select %p340_p10, %s1353_s18, 6 }
  0x31   : > { %351 = vst [vmem:[#allocation2 + $0x28] sm:$0x7] %v1311_v11  ;;  %v1415_v25 = vld [vmem:[%s1394_s20 + $0x3] ss:$0 sm:$0xff]  ;;  %v1419_v29 = vld [vmem:[%s1394_s20 + $0x4] ss:$0 sm:$0xff] }
  0x32   : > { %352 = vst [vmem:[#allocation2 + $0x30] sm:$0xff] %v1311_v11  ;;  %v370_v30 = vld [vmem:[%s1399_s15 + $0x10] sm:$0x7f]  ;;  %v1423_v33 = vld [vmem:[%s1394_s20 + $0x14] ss:$0 sm:$0xff]  ;;  %s345_s26 = scalar_lea.vmem %s1767_s3, %s1661_s17  ;;  %s342_s29 = scalar_lea.vmem %s1766_s2, %s1661_s17 }
  0x33   : > { %353 = vst [vmem:[#allocation2 + $0x38] sm:$0x7] %v1311_v11  ;;  %v1427_v36 = vld [vmem:[%s1394_s20 + $0x5] ss:$0 sm:$0xff]  ;;  %v1430_v37 = vld [vmem:[%s1394_s20 + $0x6] ss:$0 sm:$0xff] }
  0x34   : > { %354 = vst [vmem:[#allocation2 + $0x40] sm:$0xff] %v1311_v11  ;;  %v1433_v38 = vld [vmem:[%s1394_s20 + $0xa] ss:$0 sm:$0xff]  ;;  %v1436_v43 = vld [vmem:[%s1394_s20 + $0x7] ss:$0 sm:$0xff]  ;;  %v377_v51 = vmax.f32 %v370_v30, 0.0 }
  0x35   : > { %355 = vst [vmem:[#allocation2 + $0x48] sm:$0x7] %v1311_v11  ;;  %v1439_v44 = vld [vmem:[%s1394_s20 + $0x8] ss:$0 sm:$0xff]  ;;  %v1442_v45 = vld [vmem:[%s1394_s20 + $0x9] ss:$0 sm:$0xff] }
  0x36   : > { %356 = vst [vmem:[#allocation2 + $0x50] sm:$0xff] %v1311_v11  ;;  %v1445_v46 = vld [vmem:[%s1394_s20 + $0xb] ss:$0 sm:$0xff]  ;;  %v391_v52 = vld [vmem:[#allocation2] sm:$0x7f]  ;;  %s339_s6 = scalar_lea.vmem [#allocation5], %s1396_s21 }
  0x37   : > { %357 = vst [vmem:[#allocation2 + $0x58] sm:$0x7] %v1311_v11  ;;  %v414_v53 = vld [vmem:[#allocation2 + $0x1] sm:$0x7f]  ;;  %v1452_v60 = vld [vmem:[%s1394_s20 + $0xc] ss:$0 sm:$0xff] }
  0x38   : > { %358 = vst [vmem:[#allocation2 + $0x60] sm:$0xff] %v1311_v11  ;;  %v392_v1 = vld [vmem:[#allocation2 + $0x10] sm:$0x7f]  ;;  %v371_v30 = vld [vmem:[%s1399_s15 + $0x18] sm:$0x7f] }
  0x39   : > { %359 = vst [vmem:[#allocation2 + $0x68] sm:$0x7] %v1311_v11  ;;  %v415_v2 = vld [vmem:[#allocation2 + $0x11] sm:$0x7f] }
  0x3a   : > { %360 = vst [vmem:[#allocation2 + $0x70] sm:$0xff] %v1311_v11 }
  0x3b   : > { %361 = vst [vmem:[#allocation2 + $0x78] sm:$0x7] %v1311_v11 }
  0x3c   : > { %362 = vst [vmem:[#allocation2 + $0x80] sm:$0xff] %v1311_v11 }
  0x3d   : > { %363 = vst [vmem:[#allocation2 + $0x88] sm:$0x7] %v1311_v11 }
  0x3e   : > { %364 = vst [vmem:[#allocation2 + $0x90] sm:$0xff] %v1311_v11 }
  0x3f   : > { %365 = vst [vmem:[#allocation2 + $0x98] sm:$0x7] %v1311_v11 }
  0x40   : > { %366 = vst [vmem:[#allocation2 + $0xa0] sm:$0xff] %v1311_v11 }
  0x41   : > { %367 = vst [vmem:[#allocation2 + $0xa8] sm:$0x7] %v1311_v11 }
  0x42   : > { %383 = vst [vmem:[#allocation2 + $0x22] sm:$0x7f] %v375_v13 }
  0x43   : > { %384 = vst [vmem:[#allocation2 + $0x32] sm:$0x7f] %v376_v15 }
  0x44   : > { %1773 = vst [vmem:[#allocation6_spill] sm:$0xff] %v1423_v33 }
  0x45   : > { %385 = vst [vmem:[#allocation2 + $0x42] sm:$0x7f] %v377_v51 }
  0x47   : > { %v860_v26 = vld [vmem:[#allocation2 + $0xa0] sm:$0x7f] }
  0x48   : > { %v1455_v0 = vmul.f32 %v1423_v33, %v860_v26 }
  0x49   : > { %v393_v18 = vld [vmem:[#allocation2 + $0x20] sm:$0x7f] }
  0x4a   : > { %v416_v19 = vld [vmem:[#allocation2 + $0x21] sm:$0x7f]  ;;  %v401_v21 = vmul.f32 %v1404_v16, %v393_v18  ;;  %v394_v39 = vld [vmem:[#allocation2 + $0x30] sm:$0x7f]  ;;  %1774 = vst [vmem:[#allocation7_spill] sm:$0xff] %v1455_v0 }
  0x4b   : > { %v439_v20 = vld [vmem:[#allocation2 + $0x22] sm:$0x7f]  ;;  %v424_v22 = vmul.f32 %v1407_v17, %v416_v19  ;;  %v417_v40 = vld [vmem:[#allocation2 + $0x31] sm:$0x7f]  ;;  %v402_v47 = vmul.f32 %v1404_v16, %v394_v39 }
  0x4c   : > { %v462_v24 = vld [vmem:[#allocation2 + $0x23] sm:$0x7f]  ;;  %v447_v28 = vmul.f32 %v1412_v23, %v439_v20  ;;  %v440_v41 = vld [vmem:[#allocation2 + $0x32] sm:$0x7f]  ;;  %v425_v48 = vmul.f32 %v1407_v17, %v417_v40  ;;  %v399_v40 = vmul.f32 %v1404_v16, %v391_v52  ;;  %v400_v52 = vmul.f32 %v1404_v16, %v392_v1 }
  0x4d   : > { %v431_v27 = vadd.f32 %v424_v22, %v401_v21  ;;  %v485_v31 = vld [vmem:[#allocation2 + $0x24] sm:$0x7f]  ;;  %v470_v35 = vmul.f32 %v1415_v25, %v462_v24  ;;  %v448_v49 = vmul.f32 %v1412_v23, %v440_v41  ;;  %v509_v50 = vld [vmem:[#allocation2 + $0x30] sm:$0x7f]  ;;  %v422_v41 = vmul.f32 %v1407_v17, %v414_v53 }
  0x4e   : > { %v508_v32 = vld [vmem:[#allocation2 + $0x20] sm:$0x7f]  ;;  %v493_v55 = vmul.f32 %v1419_v29, %v485_v31  ;;  %v432_v61 = vadd.f32 %v425_v48, %v402_v47  ;;  %v463_v62 = vld [vmem:[#allocation2 + $0x33] sm:$0x7f]  ;;  %v517_v8 = vmul.f32 %v1427_v36, %v509_v50  ;;  %v1490_v50 = vld [vmem:[%s1394_s20 + $0xe] ss:$0 sm:$0xff]  ;;  %v423_v53 = vmul.f32 %v1407_v17, %v415_v2 }
  0x4f   : > { %v454_v34 = vadd.f32 %v447_v28, %v431_v27  ;;  %v531_v42 = vld [vmem:[#allocation2 + $0x21] sm:$0x7f]  ;;  %v532_v63 = vld [vmem:[#allocation2 + $0x31] sm:$0x7f]  ;;  %v1458_v4 = vmul.f32 %v1427_v36, %v508_v32  ;;  %v471_v21 = vmul.f32 %v1415_v25, %v463_v62  ;;  %v1479_v28 = vld [vmem:[%s1394_s20 + $0xd] ss:$0 sm:$0xff] }
  0x50   : > { %v554_v56 = vld [vmem:[#allocation2 + $0x22] sm:$0x7f]  ;;  %v1461_v5 = vmul.f32 %v1430_v37, %v531_v42  ;;  %v555_v9 = vld [vmem:[#allocation2 + $0x32] sm:$0x7f]  ;;  %v455_v13 = vadd.f32 %v448_v49, %v432_v61  ;;  %v540_v24 = vmul.f32 %v1430_v37, %v532_v63  ;;  %v1511_v2 = vld [vmem:[%s1394_s20 + $0x10] ss:$0 sm:$0xff] }
  0x51   : > { %v477_v54 = vadd.f32 %v470_v35, %v454_v34  ;;  %v577_v57 = vld [vmem:[#allocation2 + $0x23] sm:$0x7f]  ;;  %v1465_v10 = vmul.f32 %v1436_v43, %v554_v56  ;;  %v486_v14 = vld [vmem:[#allocation2 + $0x34] sm:$0x7f]  ;;  %v378_v35 = vmax.f32 %v371_v30, 0.0  ;;  %v563_v48 = vmul.f32 %v1436_v43, %v555_v9 }
  0x52   : > { %v600_v58 = vld [vmem:[#allocation2 + $0x24] sm:$0x7f]  ;;  %v1468_v11 = vmul.f32 %v1439_v44, %v577_v57  ;;  %v578_v15 = vld [vmem:[#allocation2 + $0x33] sm:$0x7f]  ;;  %v478_v42 = vadd.f32 %v471_v21, %v455_v13  ;;  %v429_v9 = vadd.f32 %v422_v41, %v399_v40 }
  0x53   : > { %v622_v59 = vld [vmem:[#allocation2 + $0x20] sm:$0x7f]  ;;  %v500_v3 = vadd.f32 %v493_v55, %v477_v54  ;;  %v1471_v12 = vmul.f32 %v1442_v45, %v600_v58  ;;  %v601_v18 = vld [vmem:[#allocation2 + $0x34] sm:$0x7f]  ;;  %386 = vst [vmem:[#allocation2 + $0x52] sm:$0x7f] %v378_v35  ;;  %v586_v62 = vmul.f32 %v1439_v44, %v578_v15 }
  0x54   : > { %v645_v6 = vld [vmem:[#allocation2 + $0x21] sm:$0x7f]  ;;  %v1474_v20 = vmul.f32 %v1433_v38, %v622_v59  ;;  %v623_v26 = vld [vmem:[#allocation2 + $0x30] sm:$0x7f]  ;;  %v494_v59 = vmul.f32 %v1419_v29, %v486_v14  ;;  %v609_v63 = vmul.f32 %v1442_v45, %v601_v18 }
  0x55   : > { %v668_v7 = vld [vmem:[#allocation2 + $0x22] sm:$0x7f]  ;;  %v524_v22 = vadd.f32 %v517_v8, %v500_v3  ;;  %v646_v27 = vld [vmem:[#allocation2 + $0x31] sm:$0x7f]  ;;  %v1483_v32 = vmul.f32 %v1445_v46, %v645_v6  ;;  %v1502_v6 = vld [vmem:[%s1394_s20 + $0xf] ss:$0 sm:$0xff]  ;;  %v1505_v8 = vmul.f32 %v1433_v38, %v623_v26 }
  0x56   : > { %v437_v19 = vld [vmem:[#allocation2 + $0x2] sm:$0x7f]  ;;  %v438_v31 = vld [vmem:[#allocation2 + $0x12] sm:$0x7f]  ;;  %v1494_v56 = vmul.f32 %v1452_v60, %v668_v7  ;;  %v1508_v1 = vmul.f32 %v1445_v46, %v646_v27  ;;  %v501_v14 = vadd.f32 %v494_v59, %v478_v42 }
  0x57   : > { %v669_v34 = vld [vmem:[#allocation2 + $0x32] sm:$0x7f]  ;;  %v547_v47 = vadd.f32 %v540_v24, %v524_v22  ;;  %v460_v7 = vld [vmem:[#allocation2 + $0x3] sm:$0x7f]  ;;  %v445_v13 = vmul.f32 %v1412_v23, %v437_v19  ;;  %v446_v26 = vmul.f32 %v1412_v23, %v438_v31 }
  0x58   : > { %v372_v39 = vld [vmem:[%s1399_s15 + $0x20] sm:$0x7f]  ;;  %v373_v54 = vld [vmem:[%s1399_s15 + $0x28] sm:$0x7f]  ;;  %1775 = vst [vmem:[#allocation8_spill] sm:$0xff] %v1494_v56  ;;  %v1515_v15 = vmul.f32 %v1452_v60, %v669_v34  ;;  %v430_v34 = vadd.f32 %v423_v53, %v400_v52 }
  0x59   : > { %v692_v49 = vld [vmem:[#allocation2 + $0x33] sm:$0x7f]  ;;  %v379_v51 = vmax.f32 %v372_v39, 0.0  ;;  %v380_v57 = vmax.f32 %v373_v54, 0.0  ;;  %v570_v61 = vadd.f32 %v563_v48, %v547_v47  ;;  %1776 = vst [vmem:[#allocation9_spill] sm:$0xff] %v1508_v1  ;;  %v452_v53 = vadd.f32 %v445_v13, %v429_v9 }
  0x5a   : > { %v744_v55 = vld [vmem:[#allocation2 + $0x90] sm:$0x7f]  ;;  %1777 = vst [vmem:[#allocation10_spill] sm:$0xff] %v1515_v15  ;;  %v1518_v18 = vmul.f32 %v1479_v28, %v692_v49  ;;  %v395_v21 = vld [vmem:[#allocation2 + $0x40] sm:$0x7f] }
  0x5b   : > { %v767_v58 = vld [vmem:[#allocation2 + $0x91] sm:$0x7f]  ;;  %387 = vst [vmem:[#allocation2 + $0x62] sm:$0x7f] %v379_v51  ;;  %v418_v22 = vld [vmem:[#allocation2 + $0x41] sm:$0x7f]  ;;  %v403_v27 = vmul.f32 %v1404_v16, %v395_v21  ;;  %v593_v47 = vadd.f32 %v586_v62, %v570_v61  ;;  %v1532_v51 = vmul.f32 %v1502_v6, %v744_v55 }
  0x5c   : > { %v715_v3 = vld [vmem:[#allocation2 + $0x34] sm:$0x7f]  ;;  %388 = vst [vmem:[#allocation2 + $0x72] sm:$0x7f] %v380_v57  ;;  %v441_v24 = vld [vmem:[#allocation2 + $0x42] sm:$0x7f]  ;;  %v426_v30 = vmul.f32 %v1407_v17, %v418_v22  ;;  %v1536_v21 = vmul.f32 %v1511_v2, %v767_v58  ;;  %v453_v58 = vadd.f32 %v446_v26, %v430_v34 }
  0x5d   : > { %1778 = vst [vmem:[#allocation11_spill] sm:$0xff] %v1518_v18  ;;  %v449_v35 = vmul.f32 %v1412_v23, %v441_v24  ;;  %v464_v19 = vld [vmem:[#allocation2 + $0x43] sm:$0x7f]  ;;  %v461_v41 = vld [vmem:[#allocation2 + $0x13] sm:$0x7f]  ;;  %v1528_v48 = vmul.f32 %v1490_v50, %v715_v3  ;;  %v468_v24 = vmul.f32 %v1415_v25, %v460_v7  ;;  %v616_v33 = vadd.f32 %v609_v63, %v593_v47 }
  0x5e   : > { %v510_v39 = vld [vmem:[#allocation2 + $0x40] sm:$0x7f]  ;;  %v790_v42 = vld [vmem:[#allocation2 + $0x92] sm:$0x7f]  ;;  %v433_v54 = vadd.f32 %v426_v30, %v403_v27  ;;  %v472_v57 = vmul.f32 %v1415_v25, %v464_v19  ;;  %1780 = vst [vmem:[#allocation13_spill] sm:$0xff] %v1536_v21  ;;  %v469_v0 = vmul.f32 %v1415_v25, %v461_v41 }
  0x5f   : > { %v1525_v40 = vld [vmem:[%s1399_s15 + $0x30] sm:$0x7f]  ;;  %1779 = vst [vmem:[#allocation12_spill] sm:$0xff] %v1528_v48  ;;  %v518_v31 = vmul.f32 %v1427_v36, %v510_v39  ;;  %v1539_v52 = vld [vmem:[%s1394_s20 + $0x11] ss:$0 sm:$0xff] }
  0x60   : > { %v533_v49 = vld [vmem:[#allocation2 + $0x41] sm:$0x7f]  ;;  %v456_v55 = vadd.f32 %v449_v35, %v433_v54  ;;  %v396_v30 = vld [vmem:[#allocation2 + $0x50] sm:$0x7f]  ;;  %v1545_v19 = vmul.f32 %v1539_v52, %v790_v42 }
  0x61   : > { %v556_v59 = vld [vmem:[#allocation2 + $0x42] sm:$0x7f]  ;;  %v525_v62 = vadd.f32 %v518_v31, %v501_v14  ;;  %v541_v3 = vmul.f32 %v1430_v37, %v533_v49  ;;  %v404_v14 = vmul.f32 %v1404_v16, %v396_v30  ;;  %v419_v31 = vld [vmem:[#allocation2 + $0x51] sm:$0x7f] }
  0x62   : > { %v487_v61 = vld [vmem:[#allocation2 + $0x44] sm:$0x7f]  ;;  %1781 = vst [vmem:[#allocation14_spill] sm:$0xff] %v1545_v19  ;;  %v564_v13 = vmul.f32 %v1436_v43, %v556_v59  ;;  %v442_v49 = vld [vmem:[#allocation2 + $0x52] sm:$0x7f]  ;;  %v479_v35 = vadd.f32 %v472_v57, %v456_v55  ;;  %v427_v42 = vmul.f32 %v1407_v17, %v419_v31 }
  0x63   : > { %v579_v39 = vld [vmem:[#allocation2 + $0x43] sm:$0x7f]  ;;  %v548_v9 = vadd.f32 %v541_v3, %v525_v62  ;;  %v465_v22 = vld [vmem:[#allocation2 + $0x53] sm:$0x7f]  ;;  %v495_v54 = vmul.f32 %v1419_v29, %v487_v61  ;;  %v450_v26 = vmul.f32 %v1412_v23, %v442_v49  ;;  %v1555_v3 = vadd.f32 %v468_v24, %v452_v53 }
  0x64   : > { %v624_v27 = vld [vmem:[#allocation2 + $0x40] sm:$0x7f]  ;;  %v511_v34 = vld [vmem:[#allocation2 + $0x50] sm:$0x7f]  ;;  %v587_v63 = vmul.f32 %v1439_v44, %v579_v39  ;;  %v434_v55 = vadd.f32 %v427_v42, %v404_v14  ;;  %v473_v61 = vmul.f32 %v1415_v25, %v465_v22 }
  0x65   : > { %v483_v7 = vld [vmem:[#allocation2 + $0x4] sm:$0x7f]  ;;  %v571_v41 = vadd.f32 %v564_v13, %v548_v9  ;;  %v632_v47 = vmul.f32 %v1433_v38, %v624_v27  ;;  %v488_v59 = vld [vmem:[#allocation2 + $0x54] sm:$0x7f]  ;;  %v502_v18 = vadd.f32 %v495_v54, %v479_v35  ;;  %v519_v31 = vmul.f32 %v1427_v36, %v511_v34 }
  0x66   : > { %v602_v48 = vld [vmem:[#allocation2 + $0x44] sm:$0x7f]  ;;  %v534_v62 = vld [vmem:[#allocation2 + $0x51] sm:$0x7f]  ;;  %v1561_v27 = vmul.f32 %v1419_v29, %v483_v7  ;;  %v457_v19 = vadd.f32 %v450_v26, %v434_v55  ;;  %v496_v53 = vmul.f32 %v1419_v29, %v488_v59  ;;  %v1571_v55 = vadd.f32 %v469_v0, %v453_v58 }
  0x67   : > { %v484_v30 = vld [vmem:[#allocation2 + $0x14] sm:$0x7f]  ;;  %v647_v57 = vld [vmem:[#allocation2 + $0x41] sm:$0x7f]  ;;  %v594_v49 = vadd.f32 %v587_v63, %v571_v41  ;;  %v610_v9 = vmul.f32 %v1442_v45, %v602_v48  ;;  %v639_v13 = vadd.f32 %v632_v47, %v616_v33  ;;  %v526_v24 = vadd.f32 %v519_v31, %v502_v18 }
  0x68   : > { %v625_v15 = vld [vmem:[#allocation2 + $0x50] sm:$0x7f]  ;;  %v542_v35 = vmul.f32 %v1430_v37, %v534_v62  ;;  %v397_v54 = vld [vmem:[#allocation2 + $0x60] sm:$0x7f]  ;;  %v655_v34 = vmul.f32 %v1445_v46, %v647_v57  ;;  %v1568_v63 = vmul.f32 %v1419_v29, %v484_v30  ;;  %v480_v26 = vadd.f32 %v473_v61, %v457_v19 }
  0x69   : > { %v557_v39 = vld [vmem:[#allocation2 + $0x52] sm:$0x7f]  ;;  %v617_v42 = vadd.f32 %v610_v9, %v594_v49  ;;  %v633_v41 = vmul.f32 %v1433_v38, %v625_v15  ;;  %v420_v48 = vld [vmem:[#allocation2 + $0x61] sm:$0x7f]  ;;  %v405_v15 = vmul.f32 %v1404_v16, %v397_v54 }
  0x6a   : > { %v580_v14 = vld [vmem:[#allocation2 + $0x53] sm:$0x7f]  ;;  %v443_v33 = vld [vmem:[#allocation2 + $0x62] sm:$0x7f]  ;;  %v549_v47 = vadd.f32 %v542_v35, %v526_v24  ;;  %v565_v18 = vmul.f32 %v1436_v43, %v557_v39  ;;  %v662_v31 = vadd.f32 %v655_v34, %v639_v13  ;;  %v503_v1 = vadd.f32 %v496_v53, %v480_v26 }
  0x6b   : > { %v507_v22 = vld [vmem:[#allocation2 + $0x10] sm:$0x7f]  ;;  %v670_v7 = vld [vmem:[#allocation2 + $0x42] sm:$0x7f]  ;;  %v588_v49 = vmul.f32 %v1439_v44, %v580_v14  ;;  %v640_v9 = vadd.f32 %v633_v41, %v617_v42  ;;  %v428_v21 = vmul.f32 %v1407_v17, %v420_v48  ;;  %v451_v19 = vmul.f32 %v1412_v23, %v443_v33 }
  0x6c   : > { %v648_v59 = vld [vmem:[#allocation2 + $0x51] sm:$0x7f]  ;;  %v512_v62 = vld [vmem:[#allocation2 + $0x60] sm:$0x7f]  ;;  %v572_v30 = vadd.f32 %v565_v18, %v549_v47  ;;  %v678_v39 = vmul.f32 %v1452_v60, %v670_v7  ;;  %v1581_v35 = vmul.f32 %v1427_v36, %v507_v22 }
  0x6d   : > { %v603_v57 = vld [vmem:[#allocation2 + $0x54] sm:$0x7f]  ;;  %v466_v56 = vld [vmem:[#allocation2 + $0x63] sm:$0x7f]  ;;  %v656_v0 = vmul.f32 %v1445_v46, %v648_v59  ;;  %v520_v13 = vmul.f32 %v1427_v36, %v512_v62  ;;  %v435_v17 = vadd.f32 %v428_v21, %v405_v15 }
  0x6e   : > { %v535_v61 = vld [vmem:[#allocation2 + $0x61] sm:$0x7f]  ;;  %v530_v16 = vld [vmem:[#allocation2 + $0x11] sm:$0x7f]  ;;  %v595_v14 = vadd.f32 %v588_v49, %v572_v30  ;;  %v611_v53 = vmul.f32 %v1442_v45, %v603_v57  ;;  %v474_v23 = vmul.f32 %v1415_v25, %v466_v56  ;;  %v685_v34 = vadd.f32 %v678_v39, %v662_v31 }
  0x6f   : > { %v489_v58 = vld [vmem:[#allocation2 + $0x64] sm:$0x7f]  ;;  %v671_v54 = vld [vmem:[#allocation2 + $0x52] sm:$0x7f]  ;;  %v663_v48 = vadd.f32 %v656_v0, %v640_v9  ;;  %v527_v33 = vadd.f32 %v520_v13, %v503_v1  ;;  %v543_v7 = vmul.f32 %v1430_v37, %v535_v61  ;;  %v458_v47 = vadd.f32 %v451_v19, %v435_v17 }
  0x70   : > { %v626_v24 = vld [vmem:[#allocation2 + $0x60] sm:$0x7f]  ;;  %v618_v26 = vadd.f32 %v611_v53, %v595_v14  ;;  %v497_v22 = vmul.f32 %v1419_v29, %v489_v58  ;;  %v679_v49 = vmul.f32 %v1452_v60, %v671_v54  ;;  %v513_v56 = vld [vmem:[#allocation2 + $0x70] sm:$0x7f]  ;;  %v1591_v57 = vmul.f32 %v1430_v37, %v530_v16 }
  0x71   : > { %v558_v42 = vld [vmem:[#allocation2 + $0x62] sm:$0x7f]  ;;  %v634_v59 = vmul.f32 %v1433_v38, %v626_v24  ;;  %v550_v21 = vadd.f32 %v543_v7, %v527_v33  ;;  %v536_v31 = vld [vmem:[#allocation2 + $0x71] sm:$0x7f]  ;;  %v481_v15 = vadd.f32 %v474_v23, %v458_v47  ;;  %v1596_v19 = vadd.f32 %v1561_v27, %v1555_v3 }
  0x72   : > { %v693_v41 = vld [vmem:[#allocation2 + $0x43] sm:$0x7f]  ;;  %v566_v25 = vmul.f32 %v1436_v43, %v558_v42  ;;  %v694_v9 = vld [vmem:[#allocation2 + $0x53] sm:$0x7f]  ;;  %v686_v0 = vadd.f32 %v679_v49, %v663_v48  ;;  %v521_v17 = vmul.f32 %v1427_v36, %v513_v56  ;;  %v544_v23 = vmul.f32 %v1430_v37, %v536_v31 }
  0x73   : > { %v581_v18 = vld [vmem:[#allocation2 + $0x63] sm:$0x7f]  ;;  %v701_v1 = vmul.f32 %v1479_v28, %v693_v41  ;;  %v641_v29 = vadd.f32 %v634_v59, %v618_v26  ;;  %v559_v16 = vld [vmem:[#allocation2 + $0x72] sm:$0x7f]  ;;  %v504_v53 = vadd.f32 %v497_v22, %v481_v15  ;;  %v1782_v3 = vmax.f32 %v1525_v40, 0.0 }
  0x74   : > { %v649_v62 = vld [vmem:[#allocation2 + $0x61] sm:$0x7f]  ;;  %v573_v58 = vadd.f32 %v566_v25, %v550_v21  ;;  %v589_v13 = vmul.f32 %v1439_v44, %v581_v18  ;;  %v627_v42 = vld [vmem:[#allocation2 + $0x70] sm:$0x7f]  ;;  %v702_v27 = vmul.f32 %v1479_v28, %v694_v9  ;;  %v567_v37 = vmul.f32 %v1436_v43, %v559_v16 }
  0x75   : > { %v604_v30 = vld [vmem:[#allocation2 + $0x64] sm:$0x7f]  ;;  %v657_v24 = vmul.f32 %v1445_v46, %v649_v62  ;;  %v708_v14 = vadd.f32 %v701_v1, %v685_v34  ;;  %389 = vst [vmem:[#allocation2 + $0x82] sm:$0x7f] %v1782_v3  ;;  %v717_v41 = vld [vmem:[#allocation2 + $0x54] sm:$0x7f]  ;;  %v528_v36 = vadd.f32 %v521_v17, %v504_v53  ;;  %v635_v56 = vmul.f32 %v1433_v38, %v627_v42 }
  0x76   : > { %v716_v61 = vld [vmem:[#allocation2 + $0x44] sm:$0x7f]  ;;  %v740_v48 = vld [vmem:[#allocation2 + $0x50] sm:$0x7f]  ;;  %v596_v33 = vadd.f32 %v589_v13, %v573_v58  ;;  %v612_v7 = vmul.f32 %v1442_v45, %v604_v30  ;;  %v709_v40 = vadd.f32 %v702_v27, %v686_v0  ;;  %v725_v31 = vmul.f32 %v1490_v50, %v717_v41 }
  0x77   : > { %v739_v39 = vld [vmem:[#allocation2 + $0x40] sm:$0x7f]  ;;  %v664_v26 = vadd.f32 %v657_v24, %v641_v29  ;;  %v582_v47 = vld [vmem:[#allocation2 + $0x73] sm:$0x7f]  ;;  %v724_v34 = vmul.f32 %v1490_v50, %v716_v61  ;;  %v1615_v1 = vmul.f32 %v1502_v6, %v740_v48  ;;  %v551_v15 = vadd.f32 %v544_v23, %v528_v36 }
  0x78   : > { %v672_v54 = vld [vmem:[#allocation2 + $0x62] sm:$0x7f]  ;;  %v1608_v22 = vmul.f32 %v1502_v6, %v739_v39  ;;  %v650_v18 = vld [vmem:[#allocation2 + $0x71] sm:$0x7f]  ;;  %v619_v62 = vadd.f32 %v612_v7, %v596_v33  ;;  %v590_v30 = vmul.f32 %v1439_v44, %v582_v47  ;;  %v732_v23 = vadd.f32 %v725_v31, %v709_v40 }
  0x79   : > { %v763_v59 = vld [vmem:[#allocation2 + $0x51] sm:$0x7f]  ;;  %v680_v49 = vmul.f32 %v1452_v60, %v672_v54  ;;  %v695_v21 = vld [vmem:[#allocation2 + $0x63] sm:$0x7f]  ;;  %v731_v61 = vadd.f32 %v724_v34, %v708_v14  ;;  %v658_v13 = vmul.f32 %v1445_v46, %v650_v18  ;;  %v574_v54 = vadd.f32 %v567_v37, %v551_v15 }
  0x7a   : > { %v605_v25 = vld [vmem:[#allocation2 + $0x74] sm:$0x7f]  ;;  %v718_v9 = vld [vmem:[#allocation2 + $0x64] sm:$0x7f]  ;;  %v642_v58 = vadd.f32 %v635_v56, %v619_v62  ;;  %v1620_v24 = vmul.f32 %v1511_v2, %v763_v59  ;;  %v703_v16 = vmul.f32 %v1479_v28, %v695_v21  ;;  %v499_v36 = vadd.f32 %v1568_v63, %v1571_v55 }
  0x7b   : > { %v673_v29 = vld [vmem:[#allocation2 + $0x72] sm:$0x7f]  ;;  %v687_v39 = vadd.f32 %v680_v49, %v664_v26  ;;  %v741_v0 = vld [vmem:[#allocation2 + $0x60] sm:$0x7f]  ;;  %v613_v17 = vmul.f32 %v1442_v45, %v605_v25  ;;  %v726_v3 = vmul.f32 %v1490_v50, %v718_v9  ;;  %v597_v26 = vadd.f32 %v590_v30, %v574_v54 }
  0x7c   : > { %v764_v53 = vld [vmem:[#allocation2 + $0x61] sm:$0x7f]  ;;  %v696_v42 = vld [vmem:[#allocation2 + $0x73] sm:$0x7f]  ;;  %v665_v14 = vadd.f32 %v658_v13, %v642_v58  ;;  %v681_v41 = vmul.f32 %v1452_v60, %v673_v29  ;;  %v522_v37 = vadd.f32 %v1581_v35, %v1596_v19  ;;  %v749_v40 = vmul.f32 %v1502_v6, %v741_v0 }
  0x7d   : > { %v787_v27 = vld [vmem:[#allocation2 + $0x62] sm:$0x7f]  ;;  %v553_v7 = vld [vmem:[#allocation2 + $0x12] sm:$0x7f]  ;;  %v710_v18 = vadd.f32 %v703_v16, %v687_v39  ;;  %v704_v62 = vmul.f32 %v1479_v28, %v696_v42  ;;  %v772_v21 = vmul.f32 %v1511_v2, %v764_v53  ;;  %v620_v56 = vadd.f32 %v613_v17, %v597_v26 }
  0x7e   : > { %v628_v48 = vld [vmem:[#allocation2 + $0x80] sm:$0x7f]  ;;  %v719_v47 = vld [vmem:[#allocation2 + $0x74] sm:$0x7f]  ;;  %v688_v59 = vadd.f32 %v681_v41, %v665_v14  ;;  %v1635_v25 = vmul.f32 %v1539_v52, %v787_v27  ;;  %v756_v9 = vadd.f32 %v749_v40, %v732_v23  ;;  %v561_v30 = vmul.f32 %v1436_v43, %v553_v7 }
  0x7f   : > { %v651_v33 = vld [vmem:[#allocation2 + $0x81] sm:$0x7f]  ;;  %v636_v34 = vmul.f32 %v1433_v38, %v628_v48  ;;  %v742_v38 = vld [vmem:[#allocation2 + $0x70] sm:$0x7f]  ;;  %v727_v19 = vmul.f32 %v1490_v50, %v719_v47  ;;  %v523_v13 = vadd.f32 %v1458_v4, %v499_v36  ;;  %v545_v16 = vadd.f32 %v1591_v57, %v522_v37 }
  0x80   : > { %v674_v49 = vld [vmem:[#allocation2 + $0x82] sm:$0x7f]  ;;  %v659_v31 = vmul.f32 %v1445_v46, %v651_v33  ;;  %v576_v55 = vld [vmem:[#allocation2 + $0x13] sm:$0x7f]  ;;  %v711_v35 = vadd.f32 %v704_v62, %v688_v59  ;;  %v733_v53 = vadd.f32 %v726_v3, %v710_v18  ;;  %v750_v17 = vmul.f32 %v1502_v6, %v742_v38  ;;  %v1656_v18 = vld [vmem:[%s1394_s20 + $0x12] ss:$0 sm:$0xff] }
  0x81   : > { %v697_v63 = vld [vmem:[#allocation2 + $0x83] sm:$0x7f]  ;;  %v765_v15 = vld [vmem:[#allocation2 + $0x71] sm:$0x7f]  ;;  %v643_v29 = vadd.f32 %v636_v34, %v620_v56  ;;  %v682_v39 = vmul.f32 %v1452_v60, %v674_v49  ;;  %v546_v43 = vadd.f32 %v1461_v5, %v523_v13  ;;  %v568_v14 = vadd.f32 %v561_v30, %v545_v16 }
  0x82   : > { %v720_v0 = vld [vmem:[#allocation2 + $0x84] sm:$0x7f]  ;;  %v599_v46 = vld [vmem:[#allocation2 + $0x14] sm:$0x7f]  ;;  %v734_v54 = vadd.f32 %v727_v19, %v711_v35  ;;  %v705_v42 = vmul.f32 %v1479_v28, %v697_v63  ;;  %v584_v60 = vmul.f32 %v1439_v44, %v576_v55  ;;  %v773_v4 = vmul.f32 %v1511_v2, %v765_v15  ;;  %v1670_v63 = vld [vmem:[%s1394_s20 + $0x13] ss:$0 sm:$0xff] }
  0x83   : > { %v743_v58 = vld [vmem:[#allocation2 + $0x80] sm:$0x7f]  ;;  %v788_v23 = vld [vmem:[#allocation2 + $0x72] sm:$0x7f]  ;;  %v666_v27 = vadd.f32 %v659_v31, %v643_v29  ;;  %v728_v57 = vmul.f32 %v1490_v50, %v720_v0  ;;  %v755_v48 = vadd.f32 %v1615_v1, %v731_v61  ;;  %v569_v5 = vadd.f32 %v1465_v10, %v546_v43 }
  0x84   : > { %v786_v41 = vld [vmem:[#allocation2 + $0x52] sm:$0x7f]  ;;  %v751_v3 = vmul.f32 %v1502_v6, %v743_v58  ;;  %v766_v47 = vld [vmem:[#allocation2 + $0x81] sm:$0x7f]  ;;  %v591_v34 = vadd.f32 %v584_v60, %v568_v14  ;;  %v607_v44 = vmul.f32 %v1442_v45, %v599_v46  ;;  %v757_v36 = vadd.f32 %v750_v17, %v733_v53  ;;  %v1783_v14 = vld [vmem:[#allocation13_spill] sm:$0xff] }
  0x85   : > { %v813_v33 = vld [vmem:[#allocation2 + $0x93] sm:$0x7f]  ;;  %v689_v26 = vadd.f32 %v682_v39, %v666_v27  ;;  %v796_v37 = vmul.f32 %v1539_v52, %v788_v23  ;;  %v778_v1 = vadd.f32 %v1620_v24, %v755_v48  ;;  %v789_v62 = vld [vmem:[#allocation2 + $0x82] sm:$0x7f]  ;;  %v592_v10 = vadd.f32 %v1468_v11, %v569_v5 }
  0x86   : > { %v811_v7 = vld [vmem:[#allocation2 + $0x73] sm:$0x7f]  ;;  %v758_v40 = vadd.f32 %v751_v3, %v734_v54  ;;  %v614_v49 = vadd.f32 %v607_v44, %v591_v34  ;;  %v794_v45 = vmul.f32 %v1539_v52, %v786_v41  ;;  %v821_v38 = vmul.f32 %v1656_v18, %v813_v33  ;;  %v691_v24 = vld [vmem:[#allocation2 + $0x23] sm:$0x7f] }
  0x87   : > { %v836_v61 = vld [vmem:[#allocation2 + $0x94] sm:$0x7f]  ;;  %v712_v59 = vadd.f32 %v705_v42, %v689_v26  ;;  %v819_v56 = vmul.f32 %v1656_v18, %v811_v7  ;;  %v774_v31 = vmul.f32 %v1511_v2, %v766_v47  ;;  %v779_v55 = vadd.f32 %v772_v21, %v756_v9  ;;  %v812_v15 = vld [vmem:[#allocation2 + $0x83] sm:$0x7f] }
  0x88   : > { %v809_v35 = vld [vmem:[#allocation2 + $0x53] sm:$0x7f]  ;;  %v835_v30 = vld [vmem:[#allocation2 + $0x84] sm:$0x7f]  ;;  %v615_v11 = vadd.f32 %v1471_v12, %v592_v10  ;;  %v637_v29 = vadd.f32 %v1474_v20, %v614_v49  ;;  %v801_v39 = vadd.f32 %v794_v45, %v778_v1  ;;  %v780_v0 = vadd.f32 %v773_v4, %v757_v36 }
  0x89   : > { %v735_v19 = vadd.f32 %v728_v57, %v712_v59  ;;  %v781_v58 = vadd.f32 %v774_v31, %v758_v40  ;;  %v797_v13 = vmul.f32 %v1539_v52, %v789_v62  ;;  %v1680_v21 = vmul.f32 %v1670_v63, %v836_v61  ;;  %v810_v9 = vld [vmem:[#allocation2 + $0x63] sm:$0x7f]  ;;  %v832_v27 = vld [vmem:[#allocation2 + $0x54] sm:$0x7f] }
  0x8a   : > { %v638_v46 = vadd.f32 %v1505_v8, %v615_v11  ;;  %v660_v53 = vadd.f32 %v1483_v32, %v637_v29  ;;  %v714_v54 = vld [vmem:[#allocation2 + $0x24] sm:$0x7f]  ;;  %v817_v12 = vmul.f32 %v1656_v18, %v809_v35  ;;  %v820_v20 = vmul.f32 %v1656_v18, %v812_v15  ;;  %v738_v32 = vld [vmem:[#allocation2 + $0x30] sm:$0x7f]  ;;  %v1788_v49 = vld [vmem:[#allocation11_spill] sm:$0xff] }
  0x8b   : > { %v759_v16 = vadd.f32 %v1532_v51, %v735_v19  ;;  %v843_v17 = vmul.f32 %v1670_v63, %v835_v30  ;;  %v699_v42 = vmul.f32 %v1479_v28, %v691_v24  ;;  %v802_v23 = vadd.f32 %v1635_v25, %v779_v55  ;;  %v762_v43 = vld [vmem:[#allocation2 + $0x41] sm:$0x7f]  ;;  %v1784_v51 = vld [vmem:[#allocation9_spill] sm:$0xff]  ;;  %v761_v57 = vld [vmem:[#allocation2 + $0x31] sm:$0x7f] }
  0x8c   : > { %v661_v41 = vadd.f32 %v1784_v51, %v638_v46  ;;  %v1785_v8 = vld [vmem:[#allocation8_spill] sm:$0xff]  ;;  %v824_v3 = vadd.f32 %v817_v12, %v801_v39  ;;  %v804_v48 = vadd.f32 %v797_v13, %v781_v58  ;;  %v722_v33 = vmul.f32 %v1490_v50, %v714_v54  ;;  %v784_v7 = vld [vmem:[#allocation2 + $0x32] sm:$0x7f] }
  0x8d   : > { %v782_v60 = vadd.f32 %v1783_v14, %v759_v16  ;;  %v683_v4 = vadd.f32 %v1785_v8, %v660_v53  ;;  %v803_v26 = vadd.f32 %v796_v37, %v780_v0  ;;  %v818_v28 = vmul.f32 %v1656_v18, %v810_v9  ;;  %v1786_v47 = vld [vmem:[#allocation14_spill] sm:$0xff]  ;;  %v833_v36 = vld [vmem:[#allocation2 + $0x64] sm:$0x7f] }
  0x8e   : > { %v1787_v5 = vld [vmem:[#allocation10_spill] sm:$0xff]  ;;  %v840_v40 = vmul.f32 %v1670_v63, %v832_v27  ;;  %v746_v1 = vmul.f32 %v1502_v6, %v738_v32  ;;  %v769_v61 = vmul.f32 %v1511_v2, %v761_v57  ;;  %v770_v59 = vmul.f32 %v1511_v2, %v762_v43  ;;  %v785_v62 = vld [vmem:[#allocation2 + $0x42] sm:$0x7f] }
  0x8f   : > { %v805_v25 = vadd.f32 %v1786_v47, %v782_v60  ;;  %v684_v34 = vadd.f32 %v1787_v5, %v661_v41  ;;  %v706_v44 = vadd.f32 %v699_v42, %v683_v4  ;;  %v825_v50 = vadd.f32 %v818_v28, %v802_v23  ;;  %v856_v10 = vld [vmem:[#allocation2 + $0x60] sm:$0x7f]  ;;  %v834_v37 = vld [vmem:[#allocation2 + $0x74] sm:$0x7f] }
  0x90   : > { %v792_v55 = vmul.f32 %v1539_v52, %v784_v7  ;;  %v807_v35 = vld [vmem:[#allocation2 + $0x33] sm:$0x7f]  ;;  %v808_v24 = vld [vmem:[#allocation2 + $0x43] sm:$0x7f]  ;;  %v847_v19 = vadd.f32 %v840_v40, %v824_v3  ;;  %v826_v30 = vadd.f32 %v819_v56, %v803_v26  ;;  %v827_v11 = vadd.f32 %v820_v20, %v804_v48 }
  0x91   : > { %v707_v45 = vadd.f32 %v1788_v49, %v684_v34  ;;  %v729_v31 = vadd.f32 %v722_v33, %v706_v44  ;;  %v828_v15 = vadd.f32 %v821_v38, %v805_v25  ;;  %v830_v6 = vld [vmem:[#allocation2 + $0x34] sm:$0x7f]  ;;  %v841_v29 = vmul.f32 %v1670_v63, %v833_v36  ;;  %v1789_v39 = vld [vmem:[#allocation12_spill] sm:$0xff] }
  0x92   : > { %v793_v58 = vmul.f32 %v1539_v52, %v785_v62  ;;  %v857_v13 = vld [vmem:[#allocation2 + $0x70] sm:$0x7f]  ;;  %v815_v53 = vmul.f32 %v1656_v18, %v807_v35  ;;  %v816_v54 = vmul.f32 %v1656_v18, %v808_v24  ;;  %v831_v38 = vld [vmem:[#allocation2 + $0x44] sm:$0x7f]  ;;  %v842_v56 = vmul.f32 %v1670_v63, %v834_v37 }
  0x93   : > { %v730_v2 = vadd.f32 %v1789_v39, %v707_v45  ;;  %v753_v0 = vadd.f32 %v746_v1, %v729_v31  ;;  %v1790_v9 = vld [vmem:[#allocation6_spill] sm:$0xff]  ;;  %v848_v12 = vadd.f32 %v841_v29, %v825_v50  ;;  %v879_v20 = vld [vmem:[#allocation2 + $0x61] sm:$0x7f]  ;;  %v838_v27 = vmul.f32 %v1670_v63, %v830_v6 }
  0x94   : > { %v864_v16 = vmul.f32 %v1790_v9, %v856_v10  ;;  %v859_v46 = vld [vmem:[#allocation2 + $0x90] sm:$0x7f]  ;;  %v854_v52 = vld [vmem:[#allocation2 + $0x40] sm:$0x7f]  ;;  %v849_v51 = vadd.f32 %v842_v56, %v826_v30  ;;  %v850_v41 = vadd.f32 %v843_v17, %v827_v11  ;;  %v851_v8 = vadd.f32 %v1680_v21, %v828_v15 }
  0x95   : > { %v754_v42 = vadd.f32 %v1608_v22, %v730_v2  ;;  %v776_v23 = vadd.f32 %v769_v61, %v753_v0  ;;  %v858_v43 = vld [vmem:[#allocation2 + $0x80] sm:$0x7f]  ;;  %v1280_v60 = vld [vmem:[%s1394_s20 + $0x15] ss:$0 sm:$0xff]  ;;  %v865_v18 = vmul.f32 %v1790_v9, %v857_v13  ;;  %v839_v3 = vmul.f32 %v1670_v63, %v831_v38  ;;  %v1281_v40 = vld [vmem:[%s1394_s20 + $0x16] ss:$0 sm:$0xff] }
  0x96   : > { %v871_v14 = vadd.f32 %v864_v16, %v847_v19  ;;  %v855_v4 = vld [vmem:[#allocation2 + $0x50] sm:$0x7f]  ;;  %v887_v48 = vmul.f32 %v1280_v60, %v879_v20  ;;  %v883_v33 = vld [vmem:[#allocation2 + $0xa1] sm:$0x7f]  ;;  %v862_v7 = vmul.f32 %v1790_v9, %v854_v52  ;;  %v866_v26 = vmul.f32 %v1790_v9, %v858_v43  ;;  %v1283_v43 = vld [vmem:[%s1394_s20 + $0x18] ss:$0 sm:$0xff] }
  0x97   : > { %v777_v32 = vadd.f32 %v770_v59, %v754_v42  ;;  %v799_v57 = vadd.f32 %v792_v55, %v776_v23  ;;  %v880_v22 = vld [vmem:[#allocation2 + $0x71] sm:$0x7f]  ;;  %v867_v28 = vmul.f32 %v1790_v9, %v859_v46  ;;  %v872_v17 = vadd.f32 %v865_v18, %v848_v12  ;;  %v877_v47 = vld [vmem:[#allocation2 + $0x41] sm:$0x7f]  ;;  %v1791_v59 = vld [vmem:[#allocation7_spill] sm:$0xff] }
  0x98   : > { %v902_v21 = vld [vmem:[#allocation2 + $0x62] sm:$0x7f]  ;;  %v863_v34 = vmul.f32 %v1790_v9, %v855_v4  ;;  %v882_v36 = vld [vmem:[#allocation2 + $0x91] sm:$0x7f]  ;;  %v894_v63 = vadd.f32 %v887_v48, %v871_v14  ;;  %v873_v1 = vadd.f32 %v866_v26, %v849_v51  ;;  %v875_v62 = vadd.f32 %v1791_v59, %v851_v8 }
  0x99   : > { %v800_v25 = vadd.f32 %v793_v58, %v777_v32  ;;  %v822_v5 = vadd.f32 %v815_v53, %v799_v57  ;;  %v881_v44 = vld [vmem:[#allocation2 + $0x81] sm:$0x7f]  ;;  %v874_v61 = vadd.f32 %v867_v28, %v850_v41  ;;  %v878_v50 = vld [vmem:[#allocation2 + $0x51] sm:$0x7f]  ;;  %v888_v10 = vmul.f32 %v1280_v60, %v880_v22 }
  0x9a   : > { %v891_v45 = vmul.f32 %v1280_v60, %v883_v33  ;;  %v900_v31 = vld [vmem:[#allocation2 + $0x42] sm:$0x7f]  ;;  %v903_v55 = vld [vmem:[#allocation2 + $0x72] sm:$0x7f]  ;;  %v910_v35 = vmul.f32 %v1281_v40, %v902_v21  ;;  %v885_v24 = vmul.f32 %v1280_v60, %v877_v47  ;;  %v889_v19 = vmul.f32 %v1280_v60, %v881_v44 }
  0x9b   : > { %v823_v37 = vadd.f32 %v816_v54, %v800_v25  ;;  %v845_v49 = vadd.f32 %v838_v27, %v822_v5  ;;  %v890_v15 = vmul.f32 %v1280_v60, %v882_v36  ;;  %v895_v30 = vadd.f32 %v888_v10, %v872_v17  ;;  %v901_v11 = vld [vmem:[#allocation2 + $0x52] sm:$0x7f]  ;;  %v925_v6 = vld [vmem:[#allocation2 + $0x63] sm:$0x7f] }
  0x9c   : > { %v886_v2 = vmul.f32 %v1280_v60, %v878_v50  ;;  %v904_v0 = vld [vmem:[#allocation2 + $0x82] sm:$0x7f]  ;;  %v905_v58 = vld [vmem:[#allocation2 + $0x92] sm:$0x7f]  ;;  %v917_v13 = vadd.f32 %v910_v35, %v894_v63  ;;  %v896_v16 = vadd.f32 %v889_v19, %v873_v1  ;;  %v908_v54 = vmul.f32 %v1281_v40, %v900_v31 }
  0x9d   : > { %v846_v29 = vadd.f32 %v839_v3, %v823_v37  ;;  %v869_v39 = vadd.f32 %v862_v7, %v845_v49  ;;  %v1282_v9 = vld [vmem:[%s1394_s20 + $0x17] ss:$0 sm:$0xff]  ;;  %v897_v46 = vadd.f32 %v890_v15, %v874_v61  ;;  %v906_v53 = vld [vmem:[#allocation2 + $0xa2] sm:$0x7f]  ;;  %v911_v38 = vmul.f32 %v1281_v40, %v903_v55 }
  0x9e   : > { %v923_v56 = vld [vmem:[#allocation2 + $0x43] sm:$0x7f]  ;;  %v898_v42 = vadd.f32 %v891_v45, %v875_v62  ;;  %v924_v23 = vld [vmem:[#allocation2 + $0x53] sm:$0x7f]  ;;  %v933_v52 = vmul.f32 %v1282_v9, %v925_v6  ;;  %v909_v14 = vmul.f32 %v1281_v40, %v901_v11  ;;  %v912_v60 = vmul.f32 %v1281_v40, %v904_v0 }
  0x9f   : > { %v870_v12 = vadd.f32 %v863_v34, %v846_v29  ;;  %v892_v20 = vadd.f32 %v885_v24, %v869_v39  ;;  %v926_v27 = vld [vmem:[#allocation2 + $0x73] sm:$0x7f]  ;;  %v913_v51 = vmul.f32 %v1281_v40, %v905_v58  ;;  %v918_v41 = vadd.f32 %v911_v38, %v895_v30  ;;  %v946_v8 = vld [vmem:[#allocation2 + $0x44] sm:$0x7f] }
  0xa0   : > { %v948_v4 = vld [vmem:[#allocation2 + $0x64] sm:$0x7f]  ;;  %v931_v3 = vmul.f32 %v1282_v9, %v923_v56  ;;  %v940_v22 = vadd.f32 %v933_v52, %v917_v13  ;;  %v914_v48 = vmul.f32 %v1281_v40, %v906_v53  ;;  %v919_v33 = vadd.f32 %v912_v60, %v896_v16  ;;  %v947_v28 = vld [vmem:[#allocation2 + $0x54] sm:$0x7f] }
  0xa1   : > { %v893_v18 = vadd.f32 %v886_v2, %v870_v12  ;;  %v915_v32 = vadd.f32 %v908_v54, %v892_v20  ;;  %v927_v57 = vld [vmem:[#allocation2 + $0x83] sm:$0x7f]  ;;  %v932_v7 = vmul.f32 %v1282_v9, %v924_v23  ;;  %v934_v26 = vmul.f32 %v1282_v9, %v926_v27  ;;  %v928_v47 = vld [vmem:[#allocation2 + $0x93] sm:$0x7f] }
  0xa2   : > { %v929_v21 = vld [vmem:[#allocation2 + $0xa3] sm:$0x7f]  ;;  %v954_v5 = vmul.f32 %v1283_v43, %v946_v8  ;;  %v956_v34 = vmul.f32 %v1283_v43, %v948_v4  ;;  %v920_v44 = vadd.f32 %v913_v51, %v897_v46  ;;  %v935_v36 = vmul.f32 %v1282_v9, %v927_v57  ;;  %v949_v1 = vld [vmem:[#allocation2 + $0x74] sm:$0x7f] }
  0xa3   : > { %v916_v17 = vadd.f32 %v909_v14, %v893_v18  ;;  %v938_v25 = vadd.f32 %v931_v3, %v915_v32  ;;  %v941_v63 = vadd.f32 %v934_v26, %v918_v41  ;;  %v955_v59 = vmul.f32 %v1283_v43, %v947_v28  ;;  %v950_v49 = vld [vmem:[#allocation2 + $0x84] sm:$0x7f]  ;;  %v951_v19 = vld [vmem:[#allocation2 + $0x94] sm:$0x7f] }
  0xa4   : > { %v963_v50 = vadd.f32 %v956_v34, %v940_v22  ;;  %v921_v40 = vadd.f32 %v914_v48, %v898_v42  ;;  %v936_v10 = vmul.f32 %v1282_v9, %v928_v47  ;;  %v937_v37 = vmul.f32 %v1282_v9, %v929_v21  ;;  %v952_v15 = vld [vmem:[#allocation2 + $0xa4] sm:$0x7f] }
  0xa5   : > { %v939_v61 = vadd.f32 %v932_v7, %v916_v17  ;;  %v961_v62 = vadd.f32 %v954_v5, %v938_v25  ;;  %v942_v45 = vadd.f32 %v935_v36, %v919_v33  ;;  %v957_v31 = vmul.f32 %v1283_v43, %v949_v1 }
  0xa6   : > { %v943_v24 = vadd.f32 %v936_v10, %v920_v44  ;;  %v958_v30 = vmul.f32 %v1283_v43, %v950_v49  ;;  %v972_v29 = vsel %vm968_vm0, %v963_v50, 0.0  ;;  %v944_v2 = vadd.f32 %v937_v37, %v921_v40 }
  0xa7   : > { %v962_v55 = vadd.f32 %v955_v59, %v939_v61  ;;  %v969_v35 = vsel %vm968_vm0, %v961_v62, 0.0  ;;  %v964_v11 = vadd.f32 %v957_v31, %v941_v63  ;;  %v959_v0 = vmul.f32 %v1283_v43, %v951_v19 }
  0xa8   : > { %v960_v58 = vmul.f32 %v1283_v43, %v952_v15  ;;  %v965_v13 = vadd.f32 %v958_v30, %v942_v45 }
  0xa9   : > { %v970_v6 = vsel %vm968_vm0, %v962_v55, 0.0  ;;  %v966_v16 = vadd.f32 %v959_v0, %v943_v24  ;;  %v974_v46 = vsel %vm968_vm0, %v964_v11, 0.0 }
  0xaa   : > { %v971_v39 = vadd.f32 %v970_v6, %v969_v35  ;;  %v967_v54 = vadd.f32 %v960_v58, %v944_v2  ;;  %v976_v38 = vsel %vm968_vm0, %v965_v13, 0.0 }
  0xab   : > { %v978_v12 = vsel %vm968_vm0, %v966_v16, 0.0 }
  0xac   : > { %v973_v9 = vadd.f32 %v972_v29, %v971_v39  ;;  %v980_v42 = vsel %vm968_vm0, %v967_v54, 0.0  ;;  %v1023_v29 = vld [vmem:[%s342_s29] sm:$0x1] }
  0xae   : > { %v975_v53 = vadd.f32 %v974_v46, %v973_v9 }
  0xb0   : > { %v977_v56 = vadd.f32 %v976_v38, %v975_v53 }
  0xb2   : > { %v979_v20 = vadd.f32 %v978_v12, %v977_v56 }
  0xb4   : > { %v981_v23 = vadd.f32 %v980_v42, %v979_v20 }
  0xb6   : > { %v982_v27 = vrot.slane %v981_v23, 4 }
  0xb8   : > { %v983_v52 = vadd.f32 %v982_v27, %v981_v23 }
  0xba   : > { %v984_v14 = vrot.slane %v983_v52, 2 }
  0xbc   : > { %v985_v43 = vadd.f32 %v984_v14, %v983_v52 }
  0xbe   : > { %v986_v60 = vrot.slane %v985_v43, 1 }
  0xc0   : > { %v987_v51 = vadd.f32 %v986_v60, %v985_v43 }
  0xc2   : > { %v988_v41 = vmul.f32 0.020408163, %v987_v51 }
  0xc4   : > { %v989_v8 = vsub.f32 %v961_v62, %v988_v41  ;;  %v990_v4 = vsub.f32 %v962_v55, %v988_v41  ;;  %v991_v18 = vsub.f32 %v963_v50, %v988_v41  ;;  %v992_v32 = vsub.f32 %v964_v11, %v988_v41 }
  0xc5   : > { %v993_v57 = vsub.f32 %v965_v13, %v988_v41  ;;  %v994_v33 = vsub.f32 %v966_v16, %v988_v41  ;;  %v995_v47 = vsub.f32 %v967_v54, %v988_v41  ;;  %v1284_v13 = vld [vmem:[%s345_s26] ss:$0 sm:$0xff] }
  0xc6   : > { %v996_v3 = vmul.f32 %v989_v8, %v989_v8  ;;  %v997_v22 = vmul.f32 %v990_v4, %v990_v4  ;;  %v998_v48 = vmul.f32 %v991_v18, %v991_v18  ;;  %v999_v7 = vmul.f32 %v992_v32, %v992_v32 }
  0xc7   : > { %v1000_v21 = vmul.f32 %v993_v57, %v993_v57  ;;  %v1001_v34 = vmul.f32 %v994_v33, %v994_v33  ;;  %v1002_v63 = vmul.f32 %v995_v47, %v995_v47 }
  0xc8   : > { %v1003_v26 = vsel %vm968_vm0, %v996_v3, 0.0  ;;  %v1004_v28 = vsel %vm968_vm0, %v997_v22, 0.0  ;;  %v1006_v25 = vsel %vm968_vm0, %v998_v48, 0.0  ;;  %v1008_v44 = vsel %vm968_vm0, %v999_v7, 0.0 }
  0xc9   : > { %v1005_v17 = vadd.f32 %v1004_v28, %v1003_v26  ;;  %v1010_v1 = vsel %vm968_vm0, %v1000_v21, 0.0  ;;  %v1012_v59 = vsel %vm968_vm0, %v1001_v34, 0.0  ;;  %v1014_v50 = vsel %vm968_vm0, %v1002_v63, 0.0 }
  0xcb   : > { %v1007_v5 = vadd.f32 %v1006_v25, %v1005_v17 }
  0xcd   : > { %v1009_v36 = vadd.f32 %v1008_v44, %v1007_v5 }
  0xcf   : > { %v1011_v61 = vadd.f32 %v1010_v1, %v1009_v36 }
  0xd1   : > { %v1013_v62 = vadd.f32 %v1012_v59, %v1011_v61 }
  0xd3   : > { %v1015_v40 = vadd.f32 %v1014_v50, %v1013_v62 }
  0xd5   : > { %v1016_v10 = vrot.slane %v1015_v40, 4 }
  0xd7   : > { %v1017_v37 = vadd.f32 %v1016_v10, %v1015_v40 }
  0xd9   : > { %v1018_v49 = vrot.slane %v1017_v37, 2 }
  0xdb   : > { %v1019_v45 = vadd.f32 %v1018_v49, %v1017_v37 }
  0xdd   : > { %v1020_v31 = vrot.slane %v1019_v45, 1 }
  0xdf   : > { %v1021_v55 = vadd.f32 %v1020_v31, %v1019_v45 }
  0xe1   : > { %v1022_v35 = vmul.f32 0.020408163, %v1021_v55 }
  0xe3   : > { %v1025_v24 = vadd.f32 1e-05, %v1022_v35 }
  0xe5   : > { %1285 = vrsqrt.f32 %v1025_v24  ;;  %vm1032_vm2 = vweird.f32 %v1025_v24 }
  0xeb   : > { %v1286_v19 = vpop.eup %1285 }
  0xec   : > { %v1027_v15 = vmul.f32 %v1286_v19, %v1025_v24  ;;  %vm1033_vm1 = vweird.f32 %v1286_v19 }
  0xed   : > { %vm1034_vm3 = vmor %vm1032_vm2, %vm1033_vm1 }
  0xee   : > { %v1028_v30 = vmul.f32 %v1286_v19, %v1027_v15 }
  0xf0   : > { %v1029_v11 = vmul.f32 0.5, %v1028_v30 }
  0xf2   : > { %v1030_v6 = vsub.f32 1.5, %v1029_v11 }
  0xf4   : > { %v1031_v39 = vmul.f32 %v1286_v19, %v1030_v6 }
  0xf6   : > { %v1035_v2 = vsel %vm1034_vm3, %v1286_v19, %v1031_v39 }
  0xf7   : > { %v1036_v0 = vmul.f32 %v1035_v2, %v1023_v29 }
  0xf9   : > { %v1037_v58 = vperm.slane %v1036_v0, 0 }
  0xfb   : > { %v1038_v9 = vmul.f32 %v1037_v58, %v989_v8  ;;  %v1039_v16 = vmul.f32 %v1037_v58, %v990_v4  ;;  %v1040_v46 = vmul.f32 %v1037_v58, %v991_v18  ;;  %v1041_v53 = vmul.f32 %v1037_v58, %v992_v32 }
  0xfc   : > { %v1042_v54 = vmul.f32 %v1037_v58, %v993_v57  ;;  %v1043_v38 = vmul.f32 %v1037_v58, %v994_v33  ;;  %v1044_v42 = vmul.f32 %v1037_v58, %v995_v47 }
  0xfd   : > { %v1048_v56 = vadd.f32 %v1284_v13, %v1038_v9  ;;  %v1049_v12 = vadd.f32 %v1284_v13, %v1039_v16  ;;  %v1050_v20 = vadd.f32 %v1284_v13, %v1040_v46  ;;  %v1051_v23 = vadd.f32 %v1284_v13, %v1041_v53 }
  0xfe   : > { %v1052_v27 = vadd.f32 %v1284_v13, %v1042_v54  ;;  %v1053_v52 = vadd.f32 %v1284_v13, %v1043_v38  ;;  %v1054_v14 = vadd.f32 %v1284_v13, %v1044_v42 }
  0xff   : > { %1055 = vst [vmem:[%s339_s6] sm:$0x7f] %v1048_v56 }
 0x100   : > { %1056 = vst [vmem:[%s339_s6 + $0x8] sm:$0x7f] %v1049_v12 }
 0x101   : > { %1057 = vst [vmem:[%s339_s6 + $0x10] sm:$0x7f] %v1050_v20  ;;  %1068 = sbr.rel (!%p1372_p5) target bundleno = 270 (0x10e), region = 116 }
 0x102   : > { %1058 = vst [vmem:[%s339_s6 + $0x18] sm:$0x7f] %v1051_v23 }
 0x103   : > { %1059 = vst [vmem:[%s339_s6 + $0x20] sm:$0x7f] %v1052_v27 }
 0x104   : > { %1060 = vst [vmem:[%s339_s6 + $0x28] sm:$0x7f] %v1053_v52 }
 0x105   : > { %1061 = vst [vmem:[%s339_s6 + $0x30] sm:$0x7f] %v1054_v14 }
 0x106   : > { %v1111_v43 = vld [vmem:[%s339_s6] sm:$0xff] }
 0x107   : > { %v1113_v60 = vld [vmem:[%s339_s6 + $0x8] sm:$0xff]  ;;  %1112 = vst [vmem:[%s1070_s10] sm:$0xff] %v1111_v43 }
 0x108   : > { %v1115_v51 = vld [vmem:[%s339_s6 + $0x10] sm:$0xff]  ;;  %1114 = vst [vmem:[%s1070_s10 + $0x38] sm:$0xff] %v1113_v60 }
 0x109   : > { %v1117_v41 = vld [vmem:[%s339_s6 + $0x18] sm:$0xff]  ;;  %1116 = vst [vmem:[%s1070_s10 + $0x70] sm:$0xff] %v1115_v51 }
 0x10a   : > { %v1119_v8 = vld [vmem:[%s339_s6 + $0x20] sm:$0xff]  ;;  %1118 = vst [vmem:[%s1070_s10 + $0xa8] sm:$0xff] %v1117_v41 }
 0x10b   : > { %v1121_v4 = vld [vmem:[%s339_s6 + $0x28] sm:$0xff]  ;;  %1120 = vst [vmem:[%s1070_s10 + $0xe0] sm:$0xff] %v1119_v8 }
 0x10c   : > { %v1123_v18 = vld [vmem:[%s339_s6 + $0x30] sm:$0xff]  ;;  %1122 = vst [vmem:[%s1070_s10 + $0x118] sm:$0xff] %v1121_v4 }
 0x10d   : > { %1124 = vst [vmem:[%s1070_s10 + $0x150] sm:$0xff] %v1123_v18 }
 0x10e PF: > { %p11_p11 = scmp.ge.s32.totalorder %s1356_s19, 9   ;;  %s1792_s15 = smov %s1305_s16 }
 0x10f   : > { %s1793_s16 = smov %s1366_s22  ;;  %s1794_s17 = smov %s1356_s19 }
 0x110   :  { %13 = sbr.rel (!%p11_p11) target bundleno = 2 (0x2), region = 203 }

</bundles_post_ra>
